<compile_context>
chip_gen: v6e
topology: v6e:2x2x1
jax: 0.10.0
libtpu: 0.0.40
codegen_flags: <defaults>
</compile_context>

<pallas_src>
import functools
import math
import numpy as np

import jax
import jax.numpy as jnp
from jax.experimental import pallas as pl
from jax.experimental.pallas import tpu as pltpu


MM_DTYPE = jnp.bfloat16                 # MXU operand / activation-stream dtype
_VMEM_LIMIT_BYTES = 48 * 1024 * 1024    # explicit scoped-VMEM budget: > v5e's 16 MiB
                                        # default scope, with headroom under v7x's
                                        # 64 MiB physical VMEM


def _cparams(dims):
    return pltpu.CompilerParams(dimension_semantics=dims,
                                vmem_limit_bytes=_VMEM_LIMIT_BYTES)


# ---------------------------------------------------------------------------
# Small helpers
# ---------------------------------------------------------------------------

def _layer_norm(x, gamma, beta, eps=1e-5):
    mu = jnp.mean(x, axis=-1, keepdims=True)
    var = jnp.mean((x - mu) ** 2, axis=-1, keepdims=True)
    return (x - mu) * jax.lax.rsqrt(var + eps) * gamma + beta


def _gelu_exact(x):
    # torch nn.GELU() default = exact erf formulation
    return 0.5 * x * (1.0 + jax.lax.erf(x / jnp.sqrt(jnp.float32(2.0))))


def _row_tile(n_rows):
    # 256 keeps the post-attention block (weights + GELU intermediate) inside a
    # v7x 64 MiB VMEM budget and is a multiple of the 256-wide MXU (v6e/v7x).
    for t in (256, 128):
        if n_rows % t == 0:
            return t
    return n_rows  # small case: single full block (satisfies full-dim rule)


def _col_tile(n_cols):
    for t in (2048, 1024, 512, 256, 128):
        if n_cols % t == 0:
            return t
    return n_cols


def _q_seq_tile(s):
    for t in (256, 128):
        if s % t == 0:
            return t
    return s


def _kv_seq_tile(s):
    # >= 256 preferred: amortizes the depth(=64)-deep q.k^T contraction on the
    # 2x256x256 MXU of v6e/v7x.
    for t in (512, 256, 128):
        if s % t == 0:
            return t
    return s


# ---------------------------------------------------------------------------
# Kernel 1: weight-stationary tiled  y = x @ W + b   (QKV projection, logits head)
# ---------------------------------------------------------------------------

def _matmul_bias_kernel(x_ref, w_ref, b_ref, o_ref):
    x = x_ref[...]
    if x.dtype != MM_DTYPE:
        # cheap VPU cast on a VMEM-resident tile; the residual stream must stay f32
        # in HBM because it also feeds residual adds + LayerNorm.
        x = x.astype(MM_DTYPE)
    acc = jnp.dot(x, w_ref[...], preferred_element_type=jnp.float32)
    o_ref[...] = (acc + b_ref[...]).astype(o_ref.dtype)


def matmul_bias_tiled(x2d, w, b, out_dtype=jnp.float32):
    """x2d: (R, D), w: (D, N) bf16, b: (1, N) f32 -> (R, N) out_dtype."""
    R, D = x2d.shape
    N = w.shape[1]
    tm = _row_tile(R)
    tn = _col_tile(N)
    # Weight-stationary ordering: the column (N) axis is the OUTER grid axis and the
    # row axis is innermost, so the (D, N) weight is streamed exactly once per call
    # (critical for the tied (D, V) logits head); only the small x row tiles are
    # re-streamed N/tn times.
    return pl.pallas_call(
        _matmul_bias_kernel,
        grid=(N // tn, R // tm),
        in_specs=[
            pl.BlockSpec((tm, D), lambda c, r: (r, 0)),
            pl.BlockSpec((D, tn), lambda c, r: (0, c)),
            pl.BlockSpec((1, tn), lambda c, r: (0, c)),
        ],
        out_specs=pl.BlockSpec((tm, tn), lambda c, r: (r, c)),
        out_shape=jax.ShapeDtypeStruct((R, N), out_dtype),
        compiler_params=_cparams(("parallel", "parallel")),
    )(x2d, w, b)


# ---------------------------------------------------------------------------
# Kernel 2a: flash-attention core (never materializes the (H, S, S) scores)
# ---------------------------------------------------------------------------

def _flash_attn_kernel(q_ref, k_ref, v_ref, pad_ref, ctx_ref, lse_ref,
                       m_sc, l_sc, acc_sc):
    ki = pl.program_id(2)

    @pl.when(ki == 0)
    def _():
        m_sc[...] = jnp.full(m_sc.shape, -jnp.inf, jnp.float32)
        l_sc[...] = jnp.zeros(l_sc.shape, jnp.float32)
        acc_sc[...] = jnp.zeros(acc_sc.shape, jnp.float32)

    q = q_ref[0]                        # (H, tq, depth) bf16; 1/sqrt(d_model) folded in
    k = k_ref[0]                        # (H, tkv, depth) bf16
    v = v_ref[0]                        # (H, tkv, depth) bf16
    n_h, tq, _ = q.shape
    tkv = k.shape[1]

    s = jnp.einsum("hqd,hkd->hqk", q, k,
                   preferred_element_type=jnp.float32)          # (H, tq, tkv) f32

    # causal + key-padding mask rebuilt in-kernel from global row/col indices
    row = pl.program_id(1) * tq + jax.lax.broadcasted_iota(jnp.int32, (tq, tkv), 0)
    col = ki * tkv + jax.lax.broadcasted_iota(jnp.int32, (tq, tkv), 1)
    valid = (col <= row) & (pad_ref[0] != 0)                    # (tq, tkv)
    s = jnp.where(valid[None, :, :], s, jnp.float32(-1e9))

    # online softmax update (statistics kept in f32)
    # TODO(synk): on v6e/v7x the exp could run on bf16 operands (stats stay f32) to
    # double EUP throughput; kept f32 here for numerical parity with the reference.
    m_prev = m_sc[...]                                          # (H, tq)
    m_new = jnp.maximum(m_prev, jnp.max(s, axis=-1))            # (H, tq)
    alpha = jnp.exp(m_prev - m_new)                             # (H, tq)
    p = jnp.exp(s - m_new[:, :, None])                          # (H, tq, tkv)
    l_sc[...] = alpha * l_sc[...] + jnp.sum(p, axis=-1)
    acc_sc[...] = alpha[:, :, None] * acc_sc[...] + jnp.einsum(
        "hqk,hkd->hqd", p.astype(v.dtype), v,
        preferred_element_type=jnp.float32)
    m_sc[...] = m_new

    @pl.when(ki == pl.num_programs(2) - 1)
    def _():
        inv_l = pl.reciprocal(l_sc[...], approx=True)           # EUP slot
        scaled = acc_sc[...] * inv_l[:, :, None]                # (H, tq, depth) f32
        # (H, tq, depth) -> lane-dense (tq, H*depth): static per-head concat along
        # lanes, so the ctx store is unmasked (full 128-lane writes).
        ctx_ref[0] = jnp.concatenate(
            [scaled[h] for h in range(n_h)], axis=-1).astype(ctx_ref.dtype)
        lse_ref[0] = m_sc[...] + jnp.log(l_sc[...])


def flash_attention(q, k, v, pad_valid):
    """q,k,v: (B, H, S, depth) bf16 (q pre-scaled); pad_valid: (B, 1, S) int32.

    Returns ctx: (B, S, H*depth) bf16 (lane-dense) and lse: (B, H, S) f32.
    """
    B, H, S, depth = q.shape
    D = H * depth
    tq = _q_seq_tile(S)
    tkv = _kv_seq_tile(S)
    q_spec = pl.BlockSpec((1, H, tq, depth), lambda b, qi, ki: (b, 0, qi, 0))
    kv_spec = pl.BlockSpec((1, H, tkv, depth), lambda b, qi, ki: (b, 0, ki, 0))
    ctx, lse = pl.pallas_call(
        _flash_attn_kernel,
        grid=(B, S // tq, S // tkv),
        in_specs=[
            q_spec, kv_spec, kv_spec,
            pl.BlockSpec((1, 1, tkv), lambda b, qi, ki: (b, 0, ki)),
        ],
        out_specs=(
            pl.BlockSpec((1, tq, D), lambda b, qi, ki: (b, qi, 0)),
            pl.BlockSpec((1, H, tq), lambda b, qi, ki: (b, 0, qi)),
        ),
        out_shape=(
            jax.ShapeDtypeStruct((B, S, D), MM_DTYPE),
            jax.ShapeDtypeStruct((B, H, S), jnp.float32),
        ),
        scratch_shapes=[
            pltpu.VMEM((H, tq), jnp.float32),          # running max
            pltpu.VMEM((H, tq), jnp.float32),          # running sum
            pltpu.VMEM((H, tq, depth), jnp.float32),   # running context accumulator
        ],
        compiler_params=_cparams(("parallel", "parallel", "arbitrary")),
    )(q, k, v, pad_valid)
    return ctx, lse


# ---------------------------------------------------------------------------
# Kernel 2b: optional attention probabilities (API parity), normalized with the
#            flash LSE; fully parallel tiles, bf16 output
# ---------------------------------------------------------------------------

def _attn_probs_kernel(q_ref, k_ref, pad_ref, lse_ref, p_ref):
    q = q_ref[0]
    k = k_ref[0]
    s = jnp.einsum("hqd,hkd->hqk", q, k,
                   preferred_element_type=jnp.float32)          # (H, tq, tkv)
    tq, tkv = s.shape[1], s.shape[2]
    row = pl.program_id(1) * tq + jax.lax.broadcasted_iota(jnp.int32, (tq, tkv), 0)
    col = pl.program_id(2) * tkv + jax.lax.broadcasted_iota(jnp.int32, (tq, tkv), 1)
    valid = (col <= row) & (pad_ref[0] != 0)
    s = jnp.where(valid[None, :, :], s, jnp.float32(-1e9))
    p_ref[0] = jnp.exp(s - lse_ref[0][:, :, None]).astype(p_ref.dtype)


def attention_probs(q, k, pad_valid, lse):
    B, H, S, depth = q.shape
    tq = _q_seq_tile(S)
    tkv = _kv_seq_tile(S)
    return pl.pallas_call(
        _attn_probs_kernel,
        grid=(B, S // tq, S // tkv),
        in_specs=[
            pl.BlockSpec((1, H, tq, depth), lambda b, qi, ki: (b, 0, qi, 0)),
            pl.BlockSpec((1, H, tkv, depth), lambda b, qi, ki: (b, 0, ki, 0)),
            pl.BlockSpec((1, 1, tkv), lambda b, qi, ki: (b, 0, ki)),
            pl.BlockSpec((1, H, tq), lambda b, qi, ki: (b, 0, qi)),
        ],
        out_specs=pl.BlockSpec((1, H, tq, tkv), lambda b, qi, ki: (b, 0, qi, ki)),
        out_shape=jax.ShapeDtypeStruct((B, H, S, S), MM_DTYPE),
        compiler_params=_cparams(("parallel", "parallel", "parallel")),
    )(q, k, pad_valid, lse)


# ---------------------------------------------------------------------------
# Kernel 3: output projection + residual LN + FFN + residual LN (row-tiled)
# ---------------------------------------------------------------------------

def _post_attn_kernel(x_ref, ctx_ref, wo_ref, bo_ref, g1_ref, be1_ref,
                      w1_ref, b1_ref, w2_ref, b2_ref, g2_ref, be2_ref, o_ref):
    x = x_ref[...]                                                  # (tm, D) f32
    attn_out = (jnp.dot(ctx_ref[...], wo_ref[...],                  # ctx already bf16
                        preferred_element_type=jnp.float32) + bo_ref[...])
    # resid/attn/ff dropouts are identity (eval / inference mode)
    x1 = _layer_norm(x + attn_out, g1_ref[...], be1_ref[...])

    h = (jnp.dot(x1.astype(MM_DTYPE), w1_ref[...],
                 preferred_element_type=jnp.float32) + b1_ref[...])
    h = _gelu_exact(h)
    ff = (jnp.dot(h.astype(MM_DTYPE), w2_ref[...],
                  preferred_element_type=jnp.float32) + b2_ref[...])
    o_ref[...] = _layer_norm(x1 + ff, g2_ref[...], be2_ref[...])


def post_attn_block(x2d, ctx2d, f):
    R, D = x2d.shape
    F = f["w1"].shape[1]
    tm = _row_tile(R)   # 256: fits the v7x 64 MiB VMEM budget with the resident weights

    def const(shape):
        # Constant block index -> the weight / LN params are DMA'd once per call
        # (Pallas only re-copies a block when its index changes).
        # TODO(synk): on v7x, pipeline_mode=pl.Buffered(1) on these specs would also
        # drop the redundant second buffer; left at the default here.
        return pl.BlockSpec(shape, lambda r: (0, 0))

    return pl.pallas_call(
        _post_attn_kernel,
        grid=(R // tm,),
        in_specs=[
            pl.BlockSpec((tm, D), lambda r: (r, 0)),   # x (f32 residual)
            pl.BlockSpec((tm, D), lambda r: (r, 0)),   # ctx (bf16, lane-dense)
            const((D, D)), const((1, D)),              # wo, bo
            const((1, D)), const((1, D)),              # ln1 gamma, beta
            const((D, F)), const((1, F)),              # w1, b1
            const((F, D)), const((1, D)),              # w2, b2
            const((1, D)), const((1, D)),              # ln2 gamma, beta
        ],
        out_specs=pl.BlockSpec((tm, D), lambda r: (r, 0)),
        out_shape=jax.ShapeDtypeStruct((R, D), jnp.float32),
        compiler_params=_cparams(("parallel",)),
    )(x2d, ctx2d, f["wo"], f["bo"], f["ln1g"], f["ln1b"],
      f["w1"], f["b1"], f["w2"], f["b2"], f["ln2g"], f["ln2b"])


# ---------------------------------------------------------------------------
# One-time weight preparation (hoisted out of the jitted forward)
# ---------------------------------------------------------------------------

def prepare_params(params):
    """Fuse QKV, fold 1/sqrt(d_model) into Q, cast matmul weights to bf16 and
    pre-transpose the tied embedding.  Run once, outside the forward."""
    emb = params["token_emb"]
    D = emb.shape[1]
    inv_scale = 1.0 / math.sqrt(float(D))  # reference divides scores by sqrt(d_model)
    layers = []
    for lp in params["layers"]:
        layers.append({
            "wqkv": jnp.concatenate([lp["wq"] * inv_scale, lp["wk"], lp["wv"]],
                                    axis=1).astype(MM_DTYPE),
            "bqkv": jnp.concatenate([lp["bq"] * inv_scale, lp["bk"], lp["bv"]],
                                    axis=1),
            "wo": lp["wo"].astype(MM_DTYPE), "bo": lp["bo"],
            "ln1g": lp["ln1g"], "ln1b": lp["ln1b"],
            "w1": lp["w1"].astype(MM_DTYPE), "b1": lp["b1"],
            "w2": lp["w2"].astype(MM_DTYPE), "b2": lp["b2"],
            "ln2g": lp["ln2g"], "ln2b": lp["ln2b"],
        })
    return {
        "token_emb": emb,
        "pos_emb": params["pos_emb"],
        "emb_t": emb.T.astype(MM_DTYPE),       # tied logits head weight, (D, V) bf16
        "fc_bias": params["fc_bias"],
        "layers": layers,
    }


# ---------------------------------------------------------------------------
# Full GPT forward (jitted; gather / head-split transposes are XLA glue)
# ---------------------------------------------------------------------------

@functools.partial(jax.jit, static_argnames=("n_heads", "pad_idx", "return_attn"))
def gpt_forward(tokens, prepared, n_heads, pad_idx, return_attn=True):
    B, S = tokens.shape
    emb = prepared["token_emb"]            # (V, D) f32
    V, D = emb.shape
    depth = D // n_heads

    # TODO(synk): token/positional embedding gather stays as XLA glue (jnp.take).
    x = jnp.take(emb, tokens, axis=0) + prepared["pos_emb"][:S][None, :, :]
    x2d = x.reshape(B * S, D)              # f32 residual stream (feeds LN / residuals)

    # per-key padding indicator; causal part is rebuilt inside the attention kernels
    pad_valid = (tokens != pad_idx).astype(jnp.int32).reshape(B, 1, S)

    attentions = []
    for f in prepared["layers"]:
        # fused QKV projection emitted directly in bf16 (q/k/v only feed matmuls)
        qkv = matmul_bias_tiled(x2d, f["wqkv"], f["bqkv"], out_dtype=MM_DTYPE)
        qkv = qkv.reshape(B, S, 3, n_heads, depth)
        q = qkv[:, :, 0].transpose(0, 2, 1, 3)          # (B, H, S, depth) bf16
        k = qkv[:, :, 1].transpose(0, 2, 1, 3)
        v = qkv[:, :, 2].transpose(0, 2, 1, 3)

        ctx, lse = flash_attention(q, k, v, pad_valid)   # ctx: (B, S, D) bf16
        if return_attn:
            attentions.append(attention_probs(q, k, pad_valid, lse))

        # ctx is already lane-dense (B, S, D): no transpose round trip needed
        x2d = post_attn_block(x2d, ctx.reshape(B * S, D), f)

    # tied logits head (weight-stationary over the vocab axis)
    logits = matmul_bias_tiled(x2d, prepared["emb_t"], prepared["fc_bias"],
                               out_dtype=jnp.float32).reshape(B, S, V)
    return logits, attentions


# ---------------------------------------------------------------------------
# Pure-JAX reference (for verification)
# ---------------------------------------------------------------------------

def ref_forward(tokens, params, n_heads, pad_idx):
    B, S = tokens.shape
    emb = params["token_emb"]
    D = emb.shape[1]
    depth = D // n_heads
    scale = math.sqrt(float(D))

    x = jnp.take(emb, tokens, axis=0) + params["pos_emb"][:S][None, :, :]
    pad_mask = (tokens != pad_idx).astype(jnp.int32)[:, None, :]
    sub_mask = jnp.logical_not(jnp.triu(jnp.ones((S, S), jnp.int32), k=1)).astype(jnp.int32)
    mask = (pad_mask & sub_mask)[:, None, :, :]  # (B,1,S,S)

    attns = []
    for lp in params["layers"]:
        q = x @ lp["wq"] + lp["bq"]
        k = x @ lp["wk"] + lp["bk"]
        v = x @ lp["wv"] + lp["bv"]
        qh = q.reshape(B, S, n_heads, depth).transpose(0, 2, 1, 3)
        kh = k.reshape(B, S, n_heads, depth).transpose(0, 2, 1, 3)
        vh = v.reshape(B, S, n_heads, depth).transpose(0, 2, 1, 3)
        scores = jnp.einsum("bhqd,bhkd->bhqk", qh, kh) / scale
        scores = jnp.where(mask == 0, -1e9, scores)
        p = jax.nn.softmax(scores, axis=-1)
        attns.append(p)
        ctx = jnp.einsum("bhqk,bhkd->bhqd", p, vh).transpose(0, 2, 1, 3).reshape(B, S, D)
        attn_out = ctx @ lp["wo"] + lp["bo"]
        x1 = _layer_norm(x + attn_out, lp["ln1g"], lp["ln1b"])
        h1 = _gelu_exact(x1 @ lp["w1"] + lp["b1"])
        ff_out = h1 @ lp["w2"] + lp["b2"]
        x = _layer_norm(x1 + ff_out, lp["ln2g"], lp["ln2b"])

    logits = x @ emb.T + params["fc_bias"]
    return logits, attns


# ---------------------------------------------------------------------------
# Deterministic parameter init
# ---------------------------------------------------------------------------

def init_params(key, vocab, d_model, n_layers, d_ff, max_len):
    keys = jax.random.split(key, 3 + n_layers)
    params = {
        "token_emb": 0.02 * jax.random.normal(keys[0], (vocab, d_model), jnp.float32),
        "pos_emb": 0.02 * jax.random.normal(keys[1], (max_len, d_model), jnp.float32),
        "fc_bias": 0.02 * jax.random.normal(keys[2], (1, vocab), jnp.float32),
        "layers": [],
    }
    for i in range(n_layers):
        lk = jax.random.split(keys[3 + i], 6)
        params["layers"].append({
            "wq": 0.05 * jax.random.normal(lk[0], (d_model, d_model), jnp.float32),
            "bq": jnp.zeros((1, d_model), jnp.float32),
            "wk": 0.05 * jax.random.normal(lk[1], (d_model, d_model), jnp.float32),
            "bk": jnp.zeros((1, d_model), jnp.float32),
            "wv": 0.05 * jax.random.normal(lk[2], (d_model, d_model), jnp.float32),
            "bv": jnp.zeros((1, d_model), jnp.float32),
            "wo": 0.05 * jax.random.normal(lk[3], (d_model, d_model), jnp.float32),
            "bo": jnp.zeros((1, d_model), jnp.float32),
            "ln1g": jnp.ones((1, d_model), jnp.float32),
            "ln1b": jnp.zeros((1, d_model), jnp.float32),
            "w1": 0.05 * jax.random.normal(lk[4], (d_model, d_ff), jnp.float32),
            "b1": jnp.zeros((1, d_ff), jnp.float32),
            "w2": 0.05 * jax.random.normal(lk[5], (d_ff, d_model), jnp.float32),
            "b2": jnp.zeros((1, d_model), jnp.float32),
            "ln2g": jnp.ones((1, d_model), jnp.float32),
            "ln2b": jnp.zeros((1, d_model), jnp.float32),
        })
    return params


# ---------------------------------------------------------------------------
# Main
# ---------------------------------------------------------------------------

if __name__ == "__main__":
    vocab_size = 32
    d_model = 32
    n_layers = 2
    n_heads = 4
    d_ff = 64
    max_len = 16
    pad_idx = 0
    batch = 2
    seq = 8

    key = jax.random.PRNGKey(0)
    pkey, tkey = jax.random.split(key)
    params = init_params(pkey, vocab_size, d_model, n_layers, d_ff, max_len)
    tokens = jax.random.randint(tkey, (batch, seq), 0, vocab_size, dtype=jnp.int32)

    prepared = prepare_params(params)   # one-time weight prep, outside the jitted path

    logits, attentions = gpt_forward(tokens, prepared, n_heads=n_heads,
                                     pad_idx=pad_idx, return_attn=True)
    logits = jax.block_until_ready(logits)
    attentions = [jax.block_until_ready(a) for a in attentions]

    # sanity-check against a pure-f32 JAX reference (kernels use bf16 matmul operands
    # / bf16 activation stream with f32 accumulation, hence the relaxed tolerance)
    ref_logits, ref_attns = ref_forward(tokens, params, n_heads, pad_idx)
    np.testing.assert_allclose(np.asarray(logits), np.asarray(ref_logits),
                               rtol=2e-2, atol=2e-2)
    for a, ra in zip(attentions, ref_attns):
        np.testing.assert_allclose(np.asarray(a.astype(jnp.float32)),
                                   np.asarray(ra), rtol=2e-2, atol=2e-2)

    assert logits.shape == (batch, seq, vocab_size)
    assert all(a.shape == (batch, n_heads, seq, seq) for a in attentions)
    print("KERNEL_OK")
</pallas_src>

<mosaic_0001>
module attributes {stable_mosaic.version = 11 : i64} {
  func.func @_matmul_bias_kernel(%arg0: i32, %arg1: i32, %arg2: memref<16x32xf32, #tpu.memory_space<vmem>>, %arg3: memref<32x96xbf16, #tpu.memory_space<vmem>>, %arg4: memref<1x96xf32, #tpu.memory_space<vmem>>, %arg5: memref<16x96xbf16, #tpu.memory_space<vmem>>) attributes {dimension_semantics = [#tpu.dimension_semantics<parallel>, #tpu.dimension_semantics<parallel>], iteration_bounds = array<i64: 1, 1>, scalar_prefetch = 0 : i64, scratch_operands = 0 : i64, tpu.core_type = #tpu.core_type<tc>, window_params = [{transform_indices = @transform_0, window_bounds = array<i64: 16, 32>}, {transform_indices = @transform_1, window_bounds = array<i64: 32, 96>}, {transform_indices = @transform_2, window_bounds = array<i64: 1, 96>}, {transform_indices = @transform_3, window_bounds = array<i64: 16, 96>}]} {
    %c0 = arith.constant 0 : index
    %c0_0 = arith.constant 0 : index
    %0 = vector.load %arg2[%c0, %c0_0] : memref<16x32xf32, #tpu.memory_space<vmem>>, vector<16x32xf32>
    %1 = arith.truncf %0 : vector<16x32xf32> to vector<16x32xbf16>
    %c0_1 = arith.constant 0 : index
    %c0_2 = arith.constant 0 : index
    %2 = vector.load %arg3[%c0_1, %c0_2] : memref<32x96xbf16, #tpu.memory_space<vmem>>, vector<32x96xbf16>
    %cst = arith.constant dense<0.000000e+00> : vector<16x96xf32>
    %3 = tpu.matmul %1, %2, %cst {dimension_numbers = #tpu.dot_dimension_numbers<[1], [0], [0], [1], [0, 0, 1, 1], [], []>} : vector<16x32xbf16>, vector<32x96xbf16>, vector<16x96xf32> -> vector<16x96xf32>
    %c0_3 = arith.constant 0 : index
    %c0_4 = arith.constant 0 : index
    %4 = vector.load %arg4[%c0_3, %c0_4] : memref<1x96xf32, #tpu.memory_space<vmem>>, vector<1x96xf32>
    %5 = vector.broadcast %4 : vector<1x96xf32> to vector<16x96xf32>
    %6 = arith.addf %3, %5 : vector<16x96xf32>
    %7 = arith.truncf %6 : vector<16x96xf32> to vector<16x96xbf16>
    %c0_5 = arith.constant 0 : index
    %c0_6 = arith.constant 0 : index
    %8 = vector.load %arg5[%c0_5, %c0_6] : memref<16x96xbf16, #tpu.memory_space<vmem>>, vector<16x96xbf16>
    tpu.vector_store %arg5[%c0_5, %c0_6], %7 {strides = array<i32>} : memref<16x96xbf16, #tpu.memory_space<vmem>>, vector<16x96xbf16>,
    return
  }
  func.func @transform_0(%arg0: i32, %arg1: i32) -> (i32, i32) {
    %c0_i32 = arith.constant 0 : i32
    %c0_i32_0 = arith.constant 0 : i32
    return %arg1, %c0_i32 : i32, i32
  }
  func.func @transform_1(%arg0: i32, %arg1: i32) -> (i32, i32) {
    %c0_i32 = arith.constant 0 : i32
    %c0_i32_0 = arith.constant 0 : i32
    return %c0_i32, %arg0 : i32, i32
  }
  func.func @transform_2(%arg0: i32, %arg1: i32) -> (i32, i32) {
    %c0_i32 = arith.constant 0 : i32
    %c0_i32_0 = arith.constant 0 : i32
    return %c0_i32, %arg0 : i32, i32
  }
  func.func @transform_3(%arg0: i32, %arg1: i32) -> (i32, i32) {
    %c0_i32 = arith.constant 0 : i32
    return %arg1, %arg0 : i32, i32
  }
}

module attributes {stable_mosaic.version = 11 : i64} {
  func.func @_attn_probs_kernel(%arg0: i32, %arg1: i32, %arg2: i32, %arg3: memref<1x4x8x8xbf16, #tpu.memory_space<vmem>>, %arg4: memref<1x4x8x8xbf16, #tpu.memory_space<vmem>>, %arg5: memref<1x1x8xi32, #tpu.memory_space<vmem>>, %arg6: memref<1x4x8xf32, #tpu.memory_space<vmem>>, %arg7: memref<1x4x8x8xbf16, #tpu.memory_space<vmem>>) attributes {dimension_semantics = [#tpu.dimension_semantics<parallel>, #tpu.dimension_semantics<parallel>, #tpu.dimension_semantics<parallel>], iteration_bounds = array<i64: 2, 1, 1>, scalar_prefetch = 0 : i64, scratch_operands = 0 : i64, tpu.core_type = #tpu.core_type<tc>, window_params = [{transform_indices = @transform_0, window_bounds = array<i64: 1, 4, 8, 8>}, {transform_indices = @transform_1, window_bounds = array<i64: 1, 4, 8, 8>}, {transform_indices = @transform_2, window_bounds = array<i64: 1, 1, 8>}, {transform_indices = @transform_3, window_bounds = array<i64: 1, 4, 8>}, {transform_indices = @transform_4, window_bounds = array<i64: 1, 4, 8, 8>}]} {
    %c0 = arith.constant 0 : index
    %c0_0 = arith.constant 0 : index
    %c0_1 = arith.constant 0 : index
    %c0_2 = arith.constant 0 : index
    %0 = vector.load %arg3[%c0, %c0_0, %c0_1, %c0_2] : memref<1x4x8x8xbf16, #tpu.memory_space<vmem>>, vector<1x4x8x8xbf16>
    %1 = vector.shape_cast %0 : vector<1x4x8x8xbf16> to vector<4x8x8xbf16>
    %c0_3 = arith.constant 0 : index
    %c0_4 = arith.constant 0 : index
    %c0_5 = arith.constant 0 : index
    %c0_6 = arith.constant 0 : index
    %2 = vector.load %arg4[%c0_3, %c0_4, %c0_5, %c0_6] : memref<1x4x8x8xbf16, #tpu.memory_space<vmem>>, vector<1x4x8x8xbf16>
    %3 = vector.shape_cast %2 : vector<1x4x8x8xbf16> to vector<4x8x8xbf16>
    "tpu.trace_start"() <{level = 10 : i32, message = "hqd,hkd->hqk"}> : () -> ()
    %cst = arith.constant dense<0.000000e+00> : vector<4x8x8xf32>
    %4 = tpu.matmul %1, %3, %cst {dimension_numbers = #tpu.dot_dimension_numbers<[2], [2], [1], [1], [0, 0, 0, 1, 1, 1], [0], [0]>} : vector<4x8x8xbf16>, vector<4x8x8xbf16>, vector<4x8x8xf32> -> vector<4x8x8xf32>
    "tpu.trace_stop"() : () -> ()
    %c8_i32 = arith.constant 8 : i32
    %5 = arith.muli %arg1, %c8_i32 : i32
    %6 = tpu.iota {dimensions = array<i32: 0>} : vector<8x8xi32>
    %7 = vector.broadcast %5 : i32 to vector<8x8xi32>
    %8 = arith.addi %7, %6 : vector<8x8xi32>
    %c8_i32_7 = arith.constant 8 : i32
    %9 = arith.muli %arg2, %c8_i32_7 : i32
    %10 = tpu.iota {dimensions = array<i32: 1>} : vector<8x8xi32>
    %11 = vector.broadcast %9 : i32 to vector<8x8xi32>
    %12 = arith.addi %11, %10 : vector<8x8xi32>
    %13 = arith.cmpi sle, %12, %8 : vector<8x8xi32>
    %c0_8 = arith.constant 0 : index
    %c0_9 = arith.constant 0 : index
    %c0_10 = arith.constant 0 : index
    %14 = vector.load %arg5[%c0_8, %c0_9, %c0_10] : memref<1x1x8xi32, #tpu.memory_space<vmem>>, vector<1x1x8xi32>
    %15 = vector.shape_cast %14 : vector<1x1x8xi32> to vector<1x8xi32>
    %c0_i32 = arith.constant 0 : i32
    %16 = vector.broadcast %c0_i32 : i32 to vector<1x8xi32>
    %17 = arith.cmpi ne, %15, %16 : vector<1x8xi32>
    %18 = vector.broadcast %17 : vector<1x8xi1> to vector<8x8xi1>
    %19 = arith.andi %13, %18 : vector<8x8xi1>
    %20 = vector.shape_cast %19 : vector<8x8xi1> to vector<1x8x8xi1>
    %cst_11 = arith.constant -1.000000e+09 : f32
    %21 = vector.shape_cast %20 : vector<1x8x8xi1> to vector<1x8x8xi1>
    %22 = vector.broadcast %21 : vector<1x8x8xi1> to vector<4x8x8xi1>
    %23 = vector.broadcast %cst_11 : f32 to vector<4x8x8xf32>
    %24 = arith.select %22, %4, %23 : vector<4x8x8xi1>, vector<4x8x8xf32>
    %c0_12 = arith.constant 0 : index
    %c0_13 = arith.constant 0 : index
    %c0_14 = arith.constant 0 : index
    %25 = vector.load %arg6[%c0_12, %c0_13, %c0_14] : memref<1x4x8xf32, #tpu.memory_space<vmem>>, vector<1x4x8xf32>
    %26 = vector.shape_cast %25 : vector<1x4x8xf32> to vector<4x8xf32>
    %27 = vector.shape_cast %26 : vector<4x8xf32> to vector<4x8x1xf32>
    %28 = vector.broadcast %27 : vector<4x8x1xf32> to vector<4x8x8xf32>
    %29 = arith.subf %24, %28 : vector<4x8x8xf32>
    %30 = math.exp %29 : vector<4x8x8xf32>
    %31 = arith.truncf %30 : vector<4x8x8xf32> to vector<4x8x8xbf16>
    %c0_15 = arith.constant 0 : index
    %c0_16 = arith.constant 0 : index
    %c0_17 = arith.constant 0 : index
    %c0_18 = arith.constant 0 : index
    %32 = vector.load %arg7[%c0_15, %c0_16, %c0_17, %c0_18] : memref<1x4x8x8xbf16, #tpu.memory_space<vmem>>, vector<1x4x8x8xbf16>
    %33 = vector.shape_cast %32 : vector<1x4x8x8xbf16> to vector<4x8x8xbf16>
    %34 = vector.shape_cast %31 : vector<4x8x8xbf16> to vector<1x4x8x8xbf16>
    tpu.vector_store %arg7[%c0_15, %c0_16, %c0_17, %c0_18], %34 {strides = array<i32>} : memref<1x4x8x8xbf16, #tpu.memory_space<vmem>>, vector<1x4x8x8xbf16>,
    return
  }
  func.func @transform_0(%arg0: i32, %arg1: i32, %arg2: i32) -> (i32, i32, i32, i32) {
    %c0_i32 = arith.constant 0 : i32
    %c0_i32_0 = arith.constant 0 : i32
    %c0_i32_1 = arith.constant 0 : i32
    return %arg0, %c0_i32, %arg1, %c0_i32_0 : i32, i32, i32, i32
  }
  func.func @transform_1(%arg0: i32, %arg1: i32, %arg2: i32) -> (i32, i32, i32, i32) {
    %c0_i32 = arith.constant 0 : i32
    %c0_i32_0 = arith.constant 0 : i32
    %c0_i32_1 = arith.constant 0 : i32
    return %arg0, %c0_i32, %arg2, %c0_i32_0 : i32, i32, i32, i32
  }
  func.func @transform_2(%arg0: i32, %arg1: i32, %arg2: i32) -> (i32, i32, i32) {
    %c0_i32 = arith.constant 0 : i32
    %c0_i32_0 = arith.constant 0 : i32
    return %arg0, %c0_i32, %arg2 : i32, i32, i32
  }
  func.func @transform_3(%arg0: i32, %arg1: i32, %arg2: i32) -> (i32, i32, i32) {
    %c0_i32 = arith.constant 0 : i32
    %c0_i32_0 = arith.constant 0 : i32
    return %arg0, %c0_i32, %arg1 : i32, i32, i32
  }
  func.func @transform_4(%arg0: i32, %arg1: i32, %arg2: i32) -> (i32, i32, i32, i32) {
    %c0_i32 = arith.constant 0 : i32
    %c0_i32_0 = arith.constant 0 : i32
    return %arg0, %c0_i32, %arg1, %arg2 : i32, i32, i32, i32
  }
}

module attributes {stable_mosaic.version = 11 : i64} {
  func.func @_flash_attn_kernel(%arg0: i32, %arg1: i32, %arg2: i32, %arg3: memref<1x4x8x8xbf16, #tpu.memory_space<vmem>>, %arg4: memref<1x4x8x8xbf16, #tpu.memory_space<vmem>>, %arg5: memref<1x4x8x8xbf16, #tpu.memory_space<vmem>>, %arg6: memref<1x1x8xi32, #tpu.memory_space<vmem>>, %arg7: memref<1x8x32xbf16, #tpu.memory_space<vmem>>, %arg8: memref<1x4x8xf32, #tpu.memory_space<vmem>>, %arg9: memref<4x8xf32, #tpu.memory_space<vmem>>, %arg10: memref<4x8xf32, #tpu.memory_space<vmem>>, %arg11: memref<4x8x8xf32, #tpu.memory_space<vmem>>) attributes {dimension_semantics = [#tpu.dimension_semantics<parallel>, #tpu.dimension_semantics<parallel>, #tpu.dimension_semantics<arbitrary>], iteration_bounds = array<i64: 2, 1, 1>, scalar_prefetch = 0 : i64, scratch_operands = 3 : i64, tpu.core_type = #tpu.core_type<tc>, window_params = [{transform_indices = @transform_0, window_bounds = array<i64: 1, 4, 8, 8>}, {transform_indices = @transform_1, window_bounds = array<i64: 1, 4, 8, 8>}, {transform_indices = @transform_2, window_bounds = array<i64: 1, 4, 8, 8>}, {transform_indices = @transform_3, window_bounds = array<i64: 1, 1, 8>}, {transform_indices = @transform_4, window_bounds = array<i64: 1, 8, 32>}, {transform_indices = @transform_5, window_bounds = array<i64: 1, 4, 8>}]} {
    %c0_i32 = arith.constant 0 : i32
    %0 = arith.cmpi eq, %arg2, %c0_i32 : i32
    %1 = arith.extui %0 : i1 to i32
    %c0_i32_0 = arith.constant 0 : i32
    %2 = arith.cmpi ne, %1, %c0_i32_0 : i32
    scf.if %2 {
      %cst_37 = arith.constant 0xFF800000 : f32
      %56 = vector.broadcast %cst_37 : f32 to vector<4x8xf32>
      %c0_38 = arith.constant 0 : index
      %c0_39 = arith.constant 0 : index
      %57 = vector.load %arg9[%c0_38, %c0_39] : memref<4x8xf32, #tpu.memory_space<vmem>>, vector<4x8xf32>
      tpu.vector_store %arg9[%c0_38, %c0_39], %56 {strides = array<i32>} : memref<4x8xf32, #tpu.memory_space<vmem>>, vector<4x8xf32>,
      %cst_40 = arith.constant 0.000000e+00 : f32
      %58 = vector.broadcast %cst_40 : f32 to vector<4x8xf32>
      %c0_41 = arith.constant 0 : index
      %c0_42 = arith.constant 0 : index
      %59 = vector.load %arg10[%c0_41, %c0_42] : memref<4x8xf32, #tpu.memory_space<vmem>>, vector<4x8xf32>
      tpu.vector_store %arg10[%c0_41, %c0_42], %58 {strides = array<i32>} : memref<4x8xf32, #tpu.memory_space<vmem>>, vector<4x8xf32>,
      %cst_43 = arith.constant 0.000000e+00 : f32
      %60 = vector.broadcast %cst_43 : f32 to vector<4x8x8xf32>
      %c0_44 = arith.constant 0 : index
      %c0_45 = arith.constant 0 : index
      %c0_46 = arith.constant 0 : index
      %61 = vector.load %arg11[%c0_44, %c0_45, %c0_46] : memref<4x8x8xf32, #tpu.memory_space<vmem>>, vector<4x8x8xf32>
      tpu.vector_store %arg11[%c0_44, %c0_45, %c0_46], %60 {strides = array<i32>} : memref<4x8x8xf32, #tpu.memory_space<vmem>>, vector<4x8x8xf32>,
    } else {
    }
    %c0 = arith.constant 0 : index
    %c0_1 = arith.constant 0 : index
    %c0_2 = arith.constant 0 : index
    %c0_3 = arith.constant 0 : index
    %3 = vector.load %arg3[%c0, %c0_1, %c0_2, %c0_3] : memref<1x4x8x8xbf16, #tpu.memory_space<vmem>>, vector<1x4x8x8xbf16>
    %4 = vector.shape_cast %3 : vector<1x4x8x8xbf16> to vector<4x8x8xbf16>
    %c0_4 = arith.constant 0 : index
    %c0_5 = arith.constant 0 : index
    %c0_6 = arith.constant 0 : index
    %c0_7 = arith.constant 0 : index
    %5 = vector.load %arg4[%c0_4, %c0_5, %c0_6, %c0_7] : memref<1x4x8x8xbf16, #tpu.memory_space<vmem>>, vector<1x4x8x8xbf16>
    %6 = vector.shape_cast %5 : vector<1x4x8x8xbf16> to vector<4x8x8xbf16>
    %c0_8 = arith.constant 0 : index
    %c0_9 = arith.constant 0 : index
    %c0_10 = arith.constant 0 : index
    %c0_11 = arith.constant 0 : index
    %7 = vector.load %arg5[%c0_8, %c0_9, %c0_10, %c0_11] : memref<1x4x8x8xbf16, #tpu.memory_space<vmem>>, vector<1x4x8x8xbf16>
    %8 = vector.shape_cast %7 : vector<1x4x8x8xbf16> to vector<4x8x8xbf16>
    "tpu.trace_start"() <{level = 10 : i32, message = "hqd,hkd->hqk"}> : () -> ()
    %cst = arith.constant dense<0.000000e+00> : vector<4x8x8xf32>
    %9 = tpu.matmul %4, %6, %cst {dimension_numbers = #tpu.dot_dimension_numbers<[2], [2], [1], [1], [0, 0, 0, 1, 1, 1], [0], [0]>} : vector<4x8x8xbf16>, vector<4x8x8xbf16>, vector<4x8x8xf32> -> vector<4x8x8xf32>
    "tpu.trace_stop"() : () -> ()
    %c8_i32 = arith.constant 8 : i32
    %10 = arith.muli %arg1, %c8_i32 : i32
    %11 = tpu.iota {dimensions = array<i32: 0>} : vector<8x8xi32>
    %12 = vector.broadcast %10 : i32 to vector<8x8xi32>
    %13 = arith.addi %12, %11 : vector<8x8xi32>
    %c8_i32_12 = arith.constant 8 : i32
    %14 = arith.muli %arg2, %c8_i32_12 : i32
    %15 = tpu.iota {dimensions = array<i32: 1>} : vector<8x8xi32>
    %16 = vector.broadcast %14 : i32 to vector<8x8xi32>
    %17 = arith.addi %16, %15 : vector<8x8xi32>
    %18 = arith.cmpi sle, %17, %13 : vector<8x8xi32>
    %c0_13 = arith.constant 0 : index
    %c0_14 = arith.constant 0 : index
    %c0_15 = arith.constant 0 : index
    %19 = vector.load %arg6[%c0_13, %c0_14, %c0_15] : memref<1x1x8xi32, #tpu.memory_space<vmem>>, vector<1x1x8xi32>
    %20 = vector.shape_cast %19 : vector<1x1x8xi32> to vector<1x8xi32>
    %c0_i32_16 = arith.constant 0 : i32
    %21 = vector.broadcast %c0_i32_16 : i32 to vector<1x8xi32>
    %22 = arith.cmpi ne, %20, %21 : vector<1x8xi32>
    %23 = vector.broadcast %22 : vector<1x8xi1> to vector<8x8xi1>
    %24 = arith.andi %18, %23 : vector<8x8xi1>
    %25 = vector.shape_cast %24 : vector<8x8xi1> to vector<1x8x8xi1>
    %cst_17 = arith.constant -1.000000e+09 : f32
    %26 = vector.shape_cast %25 : vector<1x8x8xi1> to vector<1x8x8xi1>
    %27 = vector.broadcast %26 : vector<1x8x8xi1> to vector<4x8x8xi1>
    %28 = vector.broadcast %cst_17 : f32 to vector<4x8x8xf32>
    %29 = arith.select %27, %9, %28 : vector<4x8x8xi1>, vector<4x8x8xf32>
    %c0_18 = arith.constant 0 : index
    %c0_19 = arith.constant 0 : index
    %30 = vector.load %arg9[%c0_18, %c0_19] : memref<4x8xf32, #tpu.memory_space<vmem>>, vector<4x8xf32>
    %cst_20 = arith.constant dense<0xFF800000> : vector<4x8xf32>
    %31 = vector.multi_reduction <maximumf>, %29, %cst_20 [2] : vector<4x8x8xf32> to vector<4x8xf32>
    %32 = arith.maximumf %30, %31 : vector<4x8xf32>
    %33 = arith.subf %30, %32 : vector<4x8xf32>
    %34 = math.exp %33 : vector<4x8xf32>
    %35 = vector.shape_cast %32 : vector<4x8xf32> to vector<4x8x1xf32>
    %36 = vector.broadcast %35 : vector<4x8x1xf32> to vector<4x8x8xf32>
    %37 = arith.subf %29, %36 : vector<4x8x8xf32>
    %38 = math.exp %37 : vector<4x8x8xf32>
    %c0_21 = arith.constant 0 : index
    %c0_22 = arith.constant 0 : index
    %39 = vector.load %arg10[%c0_21, %c0_22] : memref<4x8xf32, #tpu.memory_space<vmem>>, vector<4x8xf32>
    %40 = arith.mulf %34, %39 : vector<4x8xf32>
    %cst_23 = arith.constant dense<0.000000e+00> : vector<4x8xf32>
    %41 = vector.multi_reduction <add>, %38, %cst_23 [2] : vector<4x8x8xf32> to vector<4x8xf32>
    %42 = arith.addf %40, %41 : vector<4x8xf32>
    %c0_24 = arith.constant 0 : index
    %c0_25 = arith.constant 0 : index
    %43 = vector.load %arg10[%c0_24, %c0_25] : memref<4x8xf32, #tpu.memory_space<vmem>>, vector<4x8xf32>
    tpu.vector_store %arg10[%c0_24, %c0_25], %42 {strides = array<i32>} : memref<4x8xf32, #tpu.memory_space<vmem>>, vector<4x8xf32>,
    %44 = vector.shape_cast %34 : vector<4x8xf32> to vector<4x8x1xf32>
    %c0_26 = arith.constant 0 : index
    %c0_27 = arith.constant 0 : index
    %c0_28 = arith.constant 0 : index
    %45 = vector.load %arg11[%c0_26, %c0_27, %c0_28] : memref<4x8x8xf32, #tpu.memory_space<vmem>>, vector<4x8x8xf32>
    %46 = vector.broadcast %44 : vector<4x8x1xf32> to vector<4x8x8xf32>
    %47 = arith.mulf %46, %45 : vector<4x8x8xf32>
    %48 = arith.truncf %38 : vector<4x8x8xf32> to vector<4x8x8xbf16>
    "tpu.trace_start"() <{level = 10 : i32, message = "hqk,hkd->hqd"}> : () -> ()
    %cst_29 = arith.constant dense<0.000000e+00> : vector<4x8x8xf32>
    %49 = tpu.matmul %48, %8, %cst_29 {dimension_numbers = #tpu.dot_dimension_numbers<[2], [1], [1], [2], [0, 0, 0, 1, 1, 2], [0], [0]>} : vector<4x8x8xbf16>, vector<4x8x8xbf16>, vector<4x8x8xf32> -> vector<4x8x8xf32>
    "tpu.trace_stop"() : () -> ()
    %50 = arith.addf %47, %49 : vector<4x8x8xf32>
    %c0_30 = arith.constant 0 : index
    %c0_31 = arith.constant 0 : index
    %c0_32 = arith.constant 0 : index
    %51 = vector.load %arg11[%c0_30, %c0_31, %c0_32] : memref<4x8x8xf32, #tpu.memory_space<vmem>>, vector<4x8x8xf32>
    tpu.vector_store %arg11[%c0_30, %c0_31, %c0_32], %50 {strides = array<i32>} : memref<4x8x8xf32, #tpu.memory_space<vmem>>, vector<4x8x8xf32>,
    %c0_33 = arith.constant 0 : index
    %c0_34 = arith.constant 0 : index
    %52 = vector.load %arg9[%c0_33, %c0_34] : memref<4x8xf32, #tpu.memory_space<vmem>>, vector<4x8xf32>
    tpu.vector_store %arg9[%c0_33, %c0_34], %32 {strides = array<i32>} : memref<4x8xf32, #tpu.memory_space<vmem>>, vector<4x8xf32>,
    %c0_i32_35 = arith.constant 0 : i32
    %53 = arith.cmpi eq, %arg2, %c0_i32_35 : i32
    %54 = arith.extui %53 : i1 to i32
    %c0_i32_36 = arith.constant 0 : i32
    %55 = arith.cmpi ne, %54, %c0_i32_36 : i32
    scf.if %55 {
      %c0_37 = arith.constant 0 : index
      %c0_38 = arith.constant 0 : index
      %56 = vector.load %arg10[%c0_37, %c0_38] : memref<4x8xf32, #tpu.memory_space<vmem>>, vector<4x8xf32>
      %57 = tpu.reciprocal %56 {approx = true} : vector<4x8xf32> -> vector<4x8xf32>
      %c0_39 = arith.constant 0 : index
      %c0_40 = arith.constant 0 : index
      %c0_41 = arith.constant 0 : index
      %58 = vector.load %arg11[%c0_39, %c0_40, %c0_41] : memref<4x8x8xf32, #tpu.memory_space<vmem>>, vector<4x8x8xf32>
      %59 = vector.shape_cast %57 : vector<4x8xf32> to vector<4x8x1xf32>
      %60 = vector.broadcast %59 : vector<4x8x1xf32> to vector<4x8x8xf32>
      %61 = arith.mulf %58, %60 : vector<4x8x8xf32>
      %62 = vector.extract_strided_slice %61 {offsets = [0, 0, 0], sizes = [1, 8, 8], strides = [1, 1, 1]} : vector<4x8x8xf32> to vector<1x8x8xf32>
      %63 = vector.shape_cast %62 : vector<1x8x8xf32> to vector<8x8xf32>
      %64 = vector.extract_strided_slice %61 {offsets = [1, 0, 0], sizes = [1, 8, 8], strides = [1, 1, 1]} : vector<4x8x8xf32> to vector<1x8x8xf32>
      %65 = vector.shape_cast %64 : vector<1x8x8xf32> to vector<8x8xf32>
      %66 = vector.extract_strided_slice %61 {offsets = [2, 0, 0], sizes = [1, 8, 8], strides = [1, 1, 1]} : vector<4x8x8xf32> to vector<1x8x8xf32>
      %67 = vector.shape_cast %66 : vector<1x8x8xf32> to vector<8x8xf32>
      %68 = vector.extract_strided_slice %61 {offsets = [3, 0, 0], sizes = [1, 8, 8], strides = [1, 1, 1]} : vector<4x8x8xf32> to vector<1x8x8xf32>
      %69 = vector.shape_cast %68 : vector<1x8x8xf32> to vector<8x8xf32>
      %70 = tpu.concatenate %63, %65, %67, %69 in 1 : vector<8x8xf32>, vector<8x8xf32>, vector<8x8xf32>, vector<8x8xf32> -> vector<8x32xf32>
      %71 = arith.truncf %70 : vector<8x32xf32> to vector<8x32xbf16>
      %c0_42 = arith.constant 0 : index
      %c0_43 = arith.constant 0 : index
      %c0_44 = arith.constant 0 : index
      %72 = vector.load %arg7[%c0_42, %c0_43, %c0_44] : memref<1x8x32xbf16, #tpu.memory_space<vmem>>, vector<1x8x32xbf16>
      %73 = vector.shape_cast %72 : vector<1x8x32xbf16> to vector<8x32xbf16>
      %74 = vector.shape_cast %71 : vector<8x32xbf16> to vector<1x8x32xbf16>
      tpu.vector_store %arg7[%c0_42, %c0_43, %c0_44], %74 {strides = array<i32>} : memref<1x8x32xbf16, #tpu.memory_space<vmem>>, vector<1x8x32xbf16>,
      %c0_45 = arith.constant 0 : index
      %c0_46 = arith.constant 0 : index
      %75 = vector.load %arg9[%c0_45, %c0_46] : memref<4x8xf32, #tpu.memory_space<vmem>>, vector<4x8xf32>
      %c0_47 = arith.constant 0 : index
      %c0_48 = arith.constant 0 : index
      %76 = vector.load %arg10[%c0_47, %c0_48] : memref<4x8xf32, #tpu.memory_space<vmem>>, vector<4x8xf32>
      %77 = math.log %76 : vector<4x8xf32>
      %78 = arith.addf %75, %77 : vector<4x8xf32>
      %c0_49 = arith.constant 0 : index
      %c0_50 = arith.constant 0 : index
      %c0_51 = arith.constant 0 : index
      %79 = vector.load %arg8[%c0_49, %c0_50, %c0_51] : memref<1x4x8xf32, #tpu.memory_space<vmem>>, vector<1x4x8xf32>
      %80 = vector.shape_cast %79 : vector<1x4x8xf32> to vector<4x8xf32>
      %81 = vector.shape_cast %78 : vector<4x8xf32> to vector<1x4x8xf32>
      tpu.vector_store %arg8[%c0_49, %c0_50, %c0_51], %81 {strides = array<i32>} : memref<1x4x8xf32, #tpu.memory_space<vmem>>, vector<1x4x8xf32>,
    } else {
    }
    return
  }
  func.func @transform_0(%arg0: i32, %arg1: i32, %arg2: i32) -> (i32, i32, i32, i32) {
    %c0_i32 = arith.constant 0 : i32
    %c0_i32_0 = arith.constant 0 : i32
    %c0_i32_1 = arith.constant 0 : i32
    return %arg0, %c0_i32, %arg1, %c0_i32_0 : i32, i32, i32, i32
  }
  func.func @transform_1(%arg0: i32, %arg1: i32, %arg2: i32) -> (i32, i32, i32, i32) {
    %c0_i32 = arith.constant 0 : i32
    %c0_i32_0 = arith.constant 0 : i32
    %c0_i32_1 = arith.constant 0 : i32
    return %arg0, %c0_i32, %arg2, %c0_i32_0 : i32, i32, i32, i32
  }
  func.func @transform_2(%arg0: i32, %arg1: i32, %arg2: i32) -> (i32, i32, i32, i32) {
    %c0_i32 = arith.constant 0 : i32
    %c0_i32_0 = arith.constant 0 : i32
    %c0_i32_1 = arith.constant 0 : i32
    return %arg0, %c0_i32, %arg2, %c0_i32_0 : i32, i32, i32, i32
  }
  func.func @transform_3(%arg0: i32, %arg1: i32, %arg2: i32) -> (i32, i32, i32) {
    %c0_i32 = arith.constant 0 : i32
    %c0_i32_0 = arith.constant 0 : i32
    return %arg0, %c0_i32, %arg2 : i32, i32, i32
  }
  func.func @transform_4(%arg0: i32, %arg1: i32, %arg2: i32) -> (i32, i32, i32) {
    %c0_i32 = arith.constant 0 : i32
    %c0_i32_0 = arith.constant 0 : i32
    return %arg0, %arg1, %c0_i32 : i32, i32, i32
  }
  func.func @transform_5(%arg0: i32, %arg1: i32, %arg2: i32) -> (i32, i32, i32) {
    %c0_i32 = arith.constant 0 : i32
    %c0_i32_0 = arith.constant 0 : i32
    return %arg0, %c0_i32, %arg1 : i32, i32, i32
  }
}

module attributes {stable_mosaic.version = 11 : i64} {
  func.func @_post_attn_kernel(%arg0: i32, %arg1: memref<16x32xf32, #tpu.memory_space<vmem>>, %arg2: memref<16x32xbf16, #tpu.memory_space<vmem>>, %arg3: memref<32x32xbf16, #tpu.memory_space<vmem>>, %arg4: memref<1x32xf32, #tpu.memory_space<vmem>>, %arg5: memref<1x32xf32, #tpu.memory_space<vmem>>, %arg6: memref<1x32xf32, #tpu.memory_space<vmem>>, %arg7: memref<32x64xbf16, #tpu.memory_space<vmem>>, %arg8: memref<1x64xf32, #tpu.memory_space<vmem>>, %arg9: memref<64x32xbf16, #tpu.memory_space<vmem>>, %arg10: memref<1x32xf32, #tpu.memory_space<vmem>>, %arg11: memref<1x32xf32, #tpu.memory_space<vmem>>, %arg12: memref<1x32xf32, #tpu.memory_space<vmem>>, %arg13: memref<16x32xf32, #tpu.memory_space<vmem>>) attributes {dimension_semantics = [#tpu.dimension_semantics<parallel>], iteration_bounds = array<i64: 1>, scalar_prefetch = 0 : i64, scratch_operands = 0 : i64, tpu.core_type = #tpu.core_type<tc>, window_params = [{transform_indices = @transform_0, window_bounds = array<i64: 16, 32>}, {transform_indices = @transform_1, window_bounds = array<i64: 16, 32>}, {pipeline_mode = #tpu.pipeline_mode<synchronous>, transform_indices = @transform_2, window_bounds = array<i64: 32, 32>}, {pipeline_mode = #tpu.pipeline_mode<synchronous>, transform_indices = @transform_3, window_bounds = array<i64: 1, 32>}, {pipeline_mode = #tpu.pipeline_mode<synchronous>, transform_indices = @transform_4, window_bounds = array<i64: 1, 32>}, {pipeline_mode = #tpu.pipeline_mode<synchronous>, transform_indices = @transform_5, window_bounds = array<i64: 1, 32>}, {pipeline_mode = #tpu.pipeline_mode<synchronous>, transform_indices = @transform_6, window_bounds = array<i64: 32, 64>}, {pipeline_mode = #tpu.pipeline_mode<synchronous>, transform_indices = @transform_7, window_bounds = array<i64: 1, 64>}, {pipeline_mode = #tpu.pipeline_mode<synchronous>, transform_indices = @transform_8, window_bounds = array<i64: 64, 32>}, {pipeline_mode = #tpu.pipeline_mode<synchronous>, transform_indices = @transform_9, window_bounds = array<i64: 1, 32>}, {pipeline_mode = #tpu.pipeline_mode<synchronous>, transform_indices = @transform_10, window_bounds = array<i64: 1, 32>}, {pipeline_mode = #tpu.pipeline_mode<synchronous>, transform_indices = @transform_11, window_bounds = array<i64: 1, 32>}, {transform_indices = @transform_12, window_bounds = array<i64: 16, 32>}]} {
    %c0 = arith.constant 0 : index
    %c0_0 = arith.constant 0 : index
    %0 = vector.load %arg1[%c0, %c0_0] : memref<16x32xf32, #tpu.memory_space<vmem>>, vector<16x32xf32>
    %c0_1 = arith.constant 0 : index
    %c0_2 = arith.constant 0 : index
    %1 = vector.load %arg2[%c0_1, %c0_2] : memref<16x32xbf16, #tpu.memory_space<vmem>>, vector<16x32xbf16>
    %c0_3 = arith.constant 0 : index
    %c0_4 = arith.constant 0 : index
    %2 = vector.load %arg3[%c0_3, %c0_4] : memref<32x32xbf16, #tpu.memory_space<vmem>>, vector<32x32xbf16>
    %cst = arith.constant dense<0.000000e+00> : vector<16x32xf32>
    %3 = tpu.matmul %1, %2, %cst {dimension_numbers = #tpu.dot_dimension_numbers<[1], [0], [0], [1], [0, 0, 1, 1], [], []>} : vector<16x32xbf16>, vector<32x32xbf16>, vector<16x32xf32> -> vector<16x32xf32>
    %c0_5 = arith.constant 0 : index
    %c0_6 = arith.constant 0 : index
    %4 = vector.load %arg4[%c0_5, %c0_6] : memref<1x32xf32, #tpu.memory_space<vmem>>, vector<1x32xf32>
    %5 = vector.broadcast %4 : vector<1x32xf32> to vector<16x32xf32>
    %6 = arith.addf %3, %5 : vector<16x32xf32>
    %7 = arith.addf %0, %6 : vector<16x32xf32>
    %c0_7 = arith.constant 0 : index
    %c0_8 = arith.constant 0 : index
    %8 = vector.load %arg5[%c0_7, %c0_8] : memref<1x32xf32, #tpu.memory_space<vmem>>, vector<1x32xf32>
    %c0_9 = arith.constant 0 : index
    %c0_10 = arith.constant 0 : index
    %9 = vector.load %arg6[%c0_9, %c0_10] : memref<1x32xf32, #tpu.memory_space<vmem>>, vector<1x32xf32>
    %cst_11 = arith.constant dense<0.000000e+00> : vector<16xf32>
    %10 = vector.multi_reduction <add>, %7, %cst_11 [1] : vector<16x32xf32> to vector<16xf32>
    %11 = vector.shape_cast %10 : vector<16xf32> to vector<16x1xf32>
    %cst_12 = arith.constant 3.200000e+01 : f32
    %12 = vector.broadcast %cst_12 : f32 to vector<16x1xf32>
    %13 = arith.divf %11, %12 : vector<16x1xf32>
    %14 = vector.broadcast %13 : vector<16x1xf32> to vector<16x32xf32>
    %15 = arith.subf %7, %14 : vector<16x32xf32>
    %16 = arith.mulf %15, %15 : vector<16x32xf32>
    %cst_13 = arith.constant dense<0.000000e+00> : vector<16xf32>
    %17 = vector.multi_reduction <add>, %16, %cst_13 [1] : vector<16x32xf32> to vector<16xf32>
    %18 = vector.shape_cast %17 : vector<16xf32> to vector<16x1xf32>
    %cst_14 = arith.constant 3.200000e+01 : f32
    %19 = vector.broadcast %cst_14 : f32 to vector<16x1xf32>
    %20 = arith.divf %18, %19 : vector<16x1xf32>
    %21 = vector.broadcast %13 : vector<16x1xf32> to vector<16x32xf32>
    %22 = arith.subf %7, %21 : vector<16x32xf32>
    %cst_15 = arith.constant 9.99999974E-6 : f32
    %23 = vector.broadcast %cst_15 : f32 to vector<16x1xf32>
    %24 = arith.addf %20, %23 : vector<16x1xf32>
    %25 = math.rsqrt %24 : vector<16x1xf32>
    %26 = vector.broadcast %25 : vector<16x1xf32> to vector<16x32xf32>
    %27 = arith.mulf %22, %26 : vector<16x32xf32>
    %28 = vector.broadcast %8 : vector<1x32xf32> to vector<16x32xf32>
    %29 = arith.mulf %27, %28 : vector<16x32xf32>
    %30 = vector.broadcast %9 : vector<1x32xf32> to vector<16x32xf32>
    %31 = arith.addf %29, %30 : vector<16x32xf32>
    %32 = arith.truncf %31 : vector<16x32xf32> to vector<16x32xbf16>
    %c0_16 = arith.constant 0 : index
    %c0_17 = arith.constant 0 : index
    %33 = vector.load %arg7[%c0_16, %c0_17] : memref<32x64xbf16, #tpu.memory_space<vmem>>, vector<32x64xbf16>
    %cst_18 = arith.constant dense<0.000000e+00> : vector<16x64xf32>
    %34 = tpu.matmul %32, %33, %cst_18 {dimension_numbers = #tpu.dot_dimension_numbers<[1], [0], [0], [1], [0, 0, 1, 1], [], []>} : vector<16x32xbf16>, vector<32x64xbf16>, vector<16x64xf32> -> vector<16x64xf32>
    %c0_19 = arith.constant 0 : index
    %c0_20 = arith.constant 0 : index
    %35 = vector.load %arg8[%c0_19, %c0_20] : memref<1x64xf32, #tpu.memory_space<vmem>>, vector<1x64xf32>
    %36 = vector.broadcast %35 : vector<1x64xf32> to vector<16x64xf32>
    %37 = arith.addf %34, %36 : vector<16x64xf32>
    %cst_21 = arith.constant 5.000000e-01 : f32
    %38 = vector.broadcast %cst_21 : f32 to vector<16x64xf32>
    %39 = arith.mulf %38, %37 : vector<16x64xf32>
    %cst_22 = arith.constant 2.000000e+00 : f32
    %40 = math.sqrt %cst_22 : f32
    %41 = vector.broadcast %40 : f32 to vector<16x64xf32>
    %42 = arith.divf %37, %41 : vector<16x64xf32>
    %43 = math.erf %42 : vector<16x64xf32>
    %cst_23 = arith.constant 1.000000e+00 : f32
    %44 = vector.broadcast %cst_23 : f32 to vector<16x64xf32>
    %45 = arith.addf %44, %43 : vector<16x64xf32>
    %46 = arith.mulf %39, %45 : vector<16x64xf32>
    %47 = arith.truncf %46 : vector<16x64xf32> to vector<16x64xbf16>
    %c0_24 = arith.constant 0 : index
    %c0_25 = arith.constant 0 : index
    %48 = vector.load %arg9[%c0_24, %c0_25] : memref<64x32xbf16, #tpu.memory_space<vmem>>, vector<64x32xbf16>
    %cst_26 = arith.constant dense<0.000000e+00> : vector<16x32xf32>
    %49 = tpu.matmul %47, %48, %cst_26 {dimension_numbers = #tpu.dot_dimension_numbers<[1], [0], [0], [1], [0, 0, 1, 1], [], []>} : vector<16x64xbf16>, vector<64x32xbf16>, vector<16x32xf32> -> vector<16x32xf32>
    %c0_27 = arith.constant 0 : index
    %c0_28 = arith.constant 0 : index
    %50 = vector.load %arg10[%c0_27, %c0_28] : memref<1x32xf32, #tpu.memory_space<vmem>>, vector<1x32xf32>
    %51 = vector.broadcast %50 : vector<1x32xf32> to vector<16x32xf32>
    %52 = arith.addf %49, %51 : vector<16x32xf32>
    %53 = arith.addf %31, %52 : vector<16x32xf32>
    %c0_29 = arith.constant 0 : index
    %c0_30 = arith.constant 0 : index
    %54 = vector.load %arg11[%c0_29, %c0_30] : memref<1x32xf32, #tpu.memory_space<vmem>>, vector<1x32xf32>
    %c0_31 = arith.constant 0 : index
    %c0_32 = arith.constant 0 : index
    %55 = vector.load %arg12[%c0_31, %c0_32] : memref<1x32xf32, #tpu.memory_space<vmem>>, vector<1x32xf32>
    %cst_33 = arith.constant dense<0.000000e+00> : vector<16xf32>
    %56 = vector.multi_reduction <add>, %53, %cst_33 [1] : vector<16x32xf32> to vector<16xf32>
    %57 = vector.shape_cast %56 : vector<16xf32> to vector<16x1xf32>
    %cst_34 = arith.constant 3.200000e+01 : f32
    %58 = vector.broadcast %cst_34 : f32 to vector<16x1xf32>
    %59 = arith.divf %57, %58 : vector<16x1xf32>
    %60 = vector.broadcast %59 : vector<16x1xf32> to vector<16x32xf32>
    %61 = arith.subf %53, %60 : vector<16x32xf32>
    %62 = arith.mulf %61, %61 : vector<16x32xf32>
    %cst_35 = arith.constant dense<0.000000e+00> : vector<16xf32>
    %63 = vector.multi_reduction <add>, %62, %cst_35 [1] : vector<16x32xf32> to vector<16xf32>
    %64 = vector.shape_cast %63 : vector<16xf32> to vector<16x1xf32>
    %cst_36 = arith.constant 3.200000e+01 : f32
    %65 = vector.broadcast %cst_36 : f32 to vector<16x1xf32>
    %66 = arith.divf %64, %65 : vector<16x1xf32>
    %67 = vector.broadcast %59 : vector<16x1xf32> to vector<16x32xf32>
    %68 = arith.subf %53, %67 : vector<16x32xf32>
    %cst_37 = arith.constant 9.99999974E-6 : f32
    %69 = vector.broadcast %cst_37 : f32 to vector<16x1xf32>
    %70 = arith.addf %66, %69 : vector<16x1xf32>
    %71 = math.rsqrt %70 : vector<16x1xf32>
    %72 = vector.broadcast %71 : vector<16x1xf32> to vector<16x32xf32>
    %73 = arith.mulf %68, %72 : vector<16x32xf32>
    %74 = vector.broadcast %54 : vector<1x32xf32> to vector<16x32xf32>
    %75 = arith.mulf %73, %74 : vector<16x32xf32>
    %76 = vector.broadcast %55 : vector<1x32xf32> to vector<16x32xf32>
    %77 = arith.addf %75, %76 : vector<16x32xf32>
    %c0_38 = arith.constant 0 : index
    %c0_39 = arith.constant 0 : index
    %78 = vector.load %arg13[%c0_38, %c0_39] : memref<16x32xf32, #tpu.memory_space<vmem>>, vector<16x32xf32>
    tpu.vector_store %arg13[%c0_38, %c0_39], %77 {strides = array<i32>} : memref<16x32xf32, #tpu.memory_space<vmem>>, vector<16x32xf32>,
    return
  }
  func.func @transform_0(%arg0: i32) -> (i32, i32) {
    %c0_i32 = arith.constant 0 : i32
    %c0_i32_0 = arith.constant 0 : i32
    return %arg0, %c0_i32 : i32, i32
  }
  func.func @transform_1(%arg0: i32) -> (i32, i32) {
    %c0_i32 = arith.constant 0 : i32
    %c0_i32_0 = arith.constant 0 : i32
    return %arg0, %c0_i32 : i32, i32
  }
  func.func @transform_2(%arg0: i32) -> (i32, i32) {
    %c0_i32 = arith.constant 0 : i32
    %c0_i32_0 = arith.constant 0 : i32
    %c0_i32_1 = arith.constant 0 : i32
    return %c0_i32, %c0_i32_0 : i32, i32
  }
  func.func @transform_3(%arg0: i32) -> (i32, i32) {
    %c0_i32 = arith.constant 0 : i32
    %c0_i32_0 = arith.constant 0 : i32
    %c0_i32_1 = arith.constant 0 : i32
    return %c0_i32, %c0_i32_0 : i32, i32
  }
  func.func @transform_4(%arg0: i32) -> (i32, i32) {
    %c0_i32 = arith.constant 0 : i32
    %c0_i32_0 = arith.constant 0 : i32
    %c0_i32_1 = arith.constant 0 : i32
    return %c0_i32, %c0_i32_0 : i32, i32
  }
  func.func @transform_5(%arg0: i32) -> (i32, i32) {
    %c0_i32 = arith.constant 0 : i32
    %c0_i32_0 = arith.constant 0 : i32
    %c0_i32_1 = arith.constant 0 : i32
    return %c0_i32, %c0_i32_0 : i32, i32
  }
  func.func @transform_6(%arg0: i32) -> (i32, i32) {
    %c0_i32 = arith.constant 0 : i32
    %c0_i32_0 = arith.constant 0 : i32
    %c0_i32_1 = arith.constant 0 : i32
    return %c0_i32, %c0_i32_0 : i32, i32
  }
  func.func @transform_7(%arg0: i32) -> (i32, i32) {
    %c0_i32 = arith.constant 0 : i32
    %c0_i32_0 = arith.constant 0 : i32
    %c0_i32_1 = arith.constant 0 : i32
    return %c0_i32, %c0_i32_0 : i32, i32
  }
  func.func @transform_8(%arg0: i32) -> (i32, i32) {
    %c0_i32 = arith.constant 0 : i32
    %c0_i32_0 = arith.constant 0 : i32
    %c0_i32_1 = arith.constant 0 : i32
    return %c0_i32, %c0_i32_0 : i32, i32
  }
  func.func @transform_9(%arg0: i32) -> (i32, i32) {
    %c0_i32 = arith.constant 0 : i32
    %c0_i32_0 = arith.constant 0 : i32
    %c0_i32_1 = arith.constant 0 : i32
    return %c0_i32, %c0_i32_0 : i32, i32
  }
  func.func @transform_10(%arg0: i32) -> (i32, i32) {
    %c0_i32 = arith.constant 0 : i32
    %c0_i32_0 = arith.constant 0 : i32
    %c0_i32_1 = arith.constant 0 : i32
    return %c0_i32, %c0_i32_0 : i32, i32
  }
  func.func @transform_11(%arg0: i32) -> (i32, i32) {
    %c0_i32 = arith.constant 0 : i32
    %c0_i32_0 = arith.constant 0 : i32
    %c0_i32_1 = arith.constant 0 : i32
    return %c0_i32, %c0_i32_0 : i32, i32
  }
  func.func @transform_12(%arg0: i32) -> (i32, i32) {
    %c0_i32 = arith.constant 0 : i32
    %c0_i32_0 = arith.constant 0 : i32
    return %arg0, %c0_i32 : i32, i32
  }
}

module attributes {stable_mosaic.version = 11 : i64} {
  func.func @_matmul_bias_kernel(%arg0: i32, %arg1: i32, %arg2: memref<16x32xf32, #tpu.memory_space<vmem>>, %arg3: memref<32x32xbf16, #tpu.memory_space<vmem>>, %arg4: memref<1x32xf32, #tpu.memory_space<vmem>>, %arg5: memref<16x32xf32, #tpu.memory_space<vmem>>) attributes {dimension_semantics = [#tpu.dimension_semantics<parallel>, #tpu.dimension_semantics<parallel>], iteration_bounds = array<i64: 1, 1>, scalar_prefetch = 0 : i64, scratch_operands = 0 : i64, tpu.core_type = #tpu.core_type<tc>, window_params = [{transform_indices = @transform_0, window_bounds = array<i64: 16, 32>}, {transform_indices = @transform_1, window_bounds = array<i64: 32, 32>}, {transform_indices = @transform_2, window_bounds = array<i64: 1, 32>}, {transform_indices = @transform_3, window_bounds = array<i64: 16, 32>}]} {
    %c0 = arith.constant 0 : index
    %c0_0 = arith.constant 0 : index
    %0 = vector.load %arg2[%c0, %c0_0] : memref<16x32xf32, #tpu.memory_space<vmem>>, vector<16x32xf32>
    %1 = arith.truncf %0 : vector<16x32xf32> to vector<16x32xbf16>
    %c0_1 = arith.constant 0 : index
    %c0_2 = arith.constant 0 : index
    %2 = vector.load %arg3[%c0_1, %c0_2] : memref<32x32xbf16, #tpu.memory_space<vmem>>, vector<32x32xbf16>
    %cst = arith.constant dense<0.000000e+00> : vector<16x32xf32>
    %3 = tpu.matmul %1, %2, %cst {dimension_numbers = #tpu.dot_dimension_numbers<[1], [0], [0], [1], [0, 0, 1, 1], [], []>} : vector<16x32xbf16>, vector<32x32xbf16>, vector<16x32xf32> -> vector<16x32xf32>
    %c0_3 = arith.constant 0 : index
    %c0_4 = arith.constant 0 : index
    %4 = vector.load %arg4[%c0_3, %c0_4] : memref<1x32xf32, #tpu.memory_space<vmem>>, vector<1x32xf32>
    %5 = vector.broadcast %4 : vector<1x32xf32> to vector<16x32xf32>
    %6 = arith.addf %3, %5 : vector<16x32xf32>
    %c0_5 = arith.constant 0 : index
    %c0_6 = arith.constant 0 : index
    %7 = vector.load %arg5[%c0_5, %c0_6] : memref<16x32xf32, #tpu.memory_space<vmem>>, vector<16x32xf32>
    tpu.vector_store %arg5[%c0_5, %c0_6], %6 {strides = array<i32>} : memref<16x32xf32, #tpu.memory_space<vmem>>, vector<16x32xf32>,
    return
  }
  func.func @transform_0(%arg0: i32, %arg1: i32) -> (i32, i32) {
    %c0_i32 = arith.constant 0 : i32
    %c0_i32_0 = arith.constant 0 : i32
    return %arg1, %c0_i32 : i32, i32
  }
  func.func @transform_1(%arg0: i32, %arg1: i32) -> (i32, i32) {
    %c0_i32 = arith.constant 0 : i32
    %c0_i32_0 = arith.constant 0 : i32
    return %c0_i32, %arg0 : i32, i32
  }
  func.func @transform_2(%arg0: i32, %arg1: i32) -> (i32, i32) {
    %c0_i32 = arith.constant 0 : i32
    %c0_i32_0 = arith.constant 0 : i32
    return %c0_i32, %arg0 : i32, i32
  }
  func.func @transform_3(%arg0: i32, %arg1: i32) -> (i32, i32) {
    %c0_i32 = arith.constant 0 : i32
    return %arg1, %arg0 : i32, i32
  }
}

</mosaic_0001>

<bundles_post_ra>
// kernel: gpt_forward.11
= control target key start
LH: loop header
LB: loop body
LE: loop exit
PB: predicated region body
PF: predicated region fallthrough
CT: control target
= control target key end

     0   :  { %9 = vsyncpa [#allocation3], 0  ;;  %s1116_s0 = inlined_call_operand.vmem [shape: bf16[2,4,8,8], index: 0, kind: input, shape index: {}]   ;;  %s1117_s1 = inlined_call_operand.vmem [shape: bf16[2,4,8,8], index: 1, kind: input, shape index: {}]   ;;  %s1118_s2 = inlined_call_operand.vmem [shape: s32[2,1,8], index: 2, kind: input, shape index: {}]   ;;  %s1119_s3 = inlined_call_operand.vmem [shape: f32[2,4,8], index: 3, kind: input, shape index: {}]   ;;  %s1120_s4 = inlined_call_operand.hbm [shape: bf16[2,4,8,8], index: 4, kind: output, shape index: {}]  }
   0x1   :  { %11 = vsyncpa [#allocation3 + $0x1], 0  ;;  %s959_s15 = smov 0   ;;  %s961_s16 = smov 0  }
   0x2   :  { %s963_s17 = smov 0   ;;  %s965_s18 = smov 0  }
   0x3   :  { %s967_s19 = smov 0   ;;  %s969_s20 = smov 0  }
   0x4 LB: > { %s727_s21 = sadd.s32 4294967295, %s926_s20   ;;  %s728_s22 = sadd.s32 4294967294, %s926_s20   ;;  %s926_s20 = sphi %s969_s20, %s17_s20   ;;  %s922_s19 = sphi %s967_s19, %s1129_s19   ;;  %s918_s18 = sphi %s965_s18, %s1128_s18   ;;  %s914_s17 = sphi %s963_s17, %s1127_s17   ;;  %s910_s16 = sphi %s961_s16, %s1126_s16   ;;  %s906_s15 = sphi %s959_s15, %s1125_s15  }
   0x5   : > { %s36_s23 = sadd.s32 1, %s922_s19  ;;  %s159_s24 = sadd.s32 1, %s914_s17 }
   0x6   : > { %p38_p0 = scmp.ge.s32.totalorder %s36_s23, 2  ;;  %p169_p1 = scmp.ne.s32.totalorder %s914_s17, %s910_s16 }
   0x7   : > { %p170_p2 = scmp.eq.s32.totalorder %s727_s21, 1  ;;  %p175_p3 = scmp.ne.s32.totalorder %s910_s16, %s906_s15 }
   0x8   : > { %s1131_s23 = smov (%p38_p0, %s36_s23), 0  ;;  %p176_p5 = scmp.eq.s32.totalorder %s728_s22, 1 }
   0x9   : > { %p999_p4 = por %p170_p2, %p169_p1  ;;  %s152_s26 = ssub.s32 %s922_s19, %s1131_s23 }
   0xa   : > { %p731_p6 = scmp.ge.s32.totalorder %s926_s20, 1  ;;  %p157_p7 = scmp.eq.s32.totalorder %s152_s26, 0 }
   0xb   : > { %p1006_p8 = por %p176_p5, %p175_p3  ;;  %p235_p9 = scmp.lt.s32.totalorder %s926_s20, 3 }
   0xc   : > { %s1012_s28 = scalar_select %p157_p7, %s914_s17, %s159_s24  }
   0xd   : > { %p236_p10 = pnand %p731_p6, %p235_p9 }
   0xe   : > { %p285_p11 = scmp.lt.s32.totalorder (!%p236_p10), %s918_s18, 1  ;;  %s282_s26 = sand.u32 (!%p236_p10), 1, %s910_s16  }
   0xf   : > { %239 = sbr.rel (%p236_p10) target bundleno = 270 (0x10e), region = 36 }
  0x14   : > { %v509_v0 = vlaneseq  ;;  %v928_v1 = vmov 0.0   ;;  %s286_s29 = scalar_select %p285_p11, %s918_s18, 1  ;;  %vm929_vm0 = vmmov 0   ;;  %vm323_vm1 = vcmask 64512  }
  0x15   : > { %758 = vmatprep.subr.bf16.mxu0 %v928_v1  ;;  %764 = vmatprep.subr.bf16.mxu1 %v928_v1  ;;  %v930_v19 = vmov 0   ;;  %vm579_vm6 = vcmask 60416  }
  0x16   : > { %760 = vmatprep.mubr.msk.bf16.mxu0 %vm929_vm0, %v928_v1  ;;  %766 = vmatprep.mubr.msk.bf16.mxu1 %vm929_vm0, %v928_v1  ;;  %v510_v2 = vshrl.u32 %v509_v0, 7  ;;  %s747_s30 = sshll.u32 %s286_s29, 4  ;;  %s737_s5 = sshll.u32 %s286_s29, 2  ;;  %v515_v28 = vand.u32 127, %v509_v0 }
  0x17   : > { %s300_s8 = scalar_lea.vmem %s1117_s1, %s747_s30  ;;  %s313_s11 = scalar_lea.vmem %s1119_s3, %s737_s5 }
  0x18   : > { %v319_v3 = vld [vmem:[%s300_s8] sm:$0xf]  ;;  %v320_v4 = vld [vmem:[%s300_s8 + $0x4] sm:$0xf]  ;;  %v524_v5 = vsub.s32 0, %v510_v2  ;;  %v551_v6 = vsub.s32 2, %v510_v2  ;;  %s306_s14 = scalar_lea.vmem %s1118_s2, %s286_s29  ;;  %s1032_s24 = scalar_lea.vmem %s1116_s0, %s747_s30  ;;  %vm518_vm4 = vcmp.le.s32.totalorder %v515_v28, %v510_v2 }
  0x19   : > { %v328_v7 = vsel %vm323_vm1, %v319_v3, 0  ;;  %v374_v8 = vsel %vm323_vm1, %v320_v4, 0  ;;  %v534_v9 = vld [vmem:[%s313_s11] sm:$0xf]  ;;  %v544_v10 = vsub.s32 1, %v510_v2  ;;  %v558_v11 = vsub.s32 3, %v510_v2 }
  0x1a   : > { %759 = vmatpush3.bf16.xpose.msra.mxu0 %v328_v7  ;;  %765 = vmatpush3.bf16.xpose.msra.mxu1 %v374_v8  ;;  %v321_v12 = vld [vmem:[%s300_s8 + $0x8] sm:$0xf]  ;;  %v322_v13 = vld [vmem:[%s300_s8 + $0xc] sm:$0xf]  ;;  %v538_v14 = vrot.slane %v534_v9, %v524_v5  ;;  %v519_v15 = vld [vmem:[%s306_s14] sm:$0x1]  ;;  %v552_v16 = vrot.slane %v534_v9, %v551_v6 }
  0x1b   : > { %770 = vmatprep.subr.bf16.mxu0 %v928_v1  ;;  %776 = vmatprep.subr.bf16.mxu1 %v928_v1  ;;  %v315_v17 = vld [vmem:[%s1032_s24] sm:$0xf]  ;;  %vm520_vm2 = vcmp.ne.s32.totalorder %v519_v15, 0  ;;  %v316_v18 = vld [vmem:[%s1032_s24 + $0x4] sm:$0xf]  ;;  %v420_v21 = vsel %vm323_vm1, %v321_v12, 0  ;;  %v545_v24 = vrot.slane %v534_v9, %v544_v10  ;;  %v559_v25 = vrot.slane %v534_v9, %v558_v11 }
  0x1c   : > { %540 = vbcast.lane.b32.xlu0 %v538_v14, 256  ;;  %v521_v20 = vsel %vm520_vm2, 1, %v930_v19  ;;  %554 = vbcast.lane.b32.xlu1 %v552_v16, 256  ;;  %v466_v22 = vsel %vm323_vm1, %v322_v13, 0  ;;  %v317_v26 = vld [vmem:[%s1032_s24 + $0x8] sm:$0xf] }
  0x1d   : > { %v525_v23 = vrot.slane %v521_v20, %v524_v5  ;;  %v318_v27 = vld [vmem:[%s1032_s24 + $0xc] sm:$0xf]  ;;  %s732_s29 = sshll.u32 %s282_s26, 4  ;;  %s749_s5 = sshll.u32 %s918_s18, 8 }
  0x1e   : > { %s284_s30 = scalar_lea.vmem [#allocation2], %s732_s29  ;;  %s1065_s9 = scalar_lea.hbm %s1120_s4, %s749_s5 }
  0x1f   : > { %vm526_vm3 = vcmp.eq.s32.totalorder %v525_v23, 1  ;;  %s600_s6 = sshll.u32 %s284_s30, 4  ;;  %s1071_s18 = scalar_lea.sflag [#allocation3], %s282_s26  ;;  %s1067_s6 = int_to_ptr.vmem [resolvable:$true] %s600_s6 }
  0x20   : > { %547 = vbcast.lane.b32.xlu0 %v545_v24, 256  ;;  %561 = vbcast.lane.b32.xlu1 %v559_v25, 256  ;;  %vm1046_vm5 = vmand %vm518_vm4, %vm526_vm3  ;;  %s850_s10 = scalar_lea.vmem %s1067_s6, 256  ;;  %s931_s11 = smov [#allocation2]  }
  0x21   : > { %761 = vmatmul.mubr.msk.bf16.vlgmr.msra.gmra.mxu0 %vm323_vm1, %v315_v17  ;;  %767 = vmatmul.mubr.msk.bf16.vlgmr.msra.gmra.mxu1 %vm323_vm1, %v316_v18  ;;  %p851_p12 = scmp.ne.s32.totalorder %s1067_s6, %s850_s10  ;;  %s854_s12 = sshll.u32 %s931_s11, 4  ;;  %s855_s12 = int_to_ptr.vmem [resolvable:$false] %s854_s12 }
  0x22   : > { %771 = vmatpush3.bf16.xpose.msra.mxu0 %v420_v21  ;;  %777 = vmatpush3.bf16.xpose.msra.mxu1 %v466_v22  ;;  %s856_s13 = scalar_lea.vmem %s855_s12, 512  ;;  %p857_p1 = scmp.lt.s32.totalorder %s1067_s6, %s855_s12 }
  0x23   : > { %772 = vmatprep.mubr.msk.bf16.mxu0 %vm929_vm0, %v928_v1  ;;  %778 = vmatprep.mubr.msk.bf16.mxu1 %vm929_vm0, %v928_v1  ;;  %p852_p13 = pnand %p851_p12, %p999_p4  ;;  %p858_p2 = scmp.lt.s32.totalorder %s856_s13, %s850_s10 }
  0x25   : > { %p853_p0 = pneg %p852_p13  ;;  %p859_p3 = por %p858_p2, %p857_p1 }
  0x27   : > { %p860_p5 = pnand %p859_p3, %p853_p0 }
  0x29   : > { %773 = vmatmul.mubr.msk.bf16.vlgmr.msra.gmra.mxu0 %vm323_vm1, %v317_v26  ;;  %779 = vmatmul.mubr.msk.bf16.vlgmr.msra.gmra.mxu1 %vm323_vm1, %v318_v27 }
  0x8e   : > { %v541_v29 = vpop.permute.xlu0 %540  ;;  %v555_v36 = vpop.permute.xlu1 %554 }
  0x92   : > { %v548_v31 = vpop.permute.xlu0 %547  ;;  %v562_v47 = vpop.permute.xlu1 %561 }
  0xe1   : > { %v364_v32 = vpop.f32.mrf.mxu0  ;;  %v410_v33 = vpop.f32.mrf.mxu1 }
  0xe2   : > { %v530_v34 = vsel %vm1046_vm5, %v364_v32, -1e+09  ;;  %v531_v35 = vsel %vm1046_vm5, %v410_v33, -1e+09 }
  0xe3   : > { %v563_v37 = vsub.f32 %v530_v34, %v541_v29  ;;  %v564_v38 = vsub.f32 %v531_v35, %v548_v31  ;;  %v762_v39 = vpop.f32.mrf.mxu0  ;;  %v768_v40 = vpop.f32.mrf.mxu1 }
  0xe5   : > { %v567_v41 = vmul.f32 1.442695, %v563_v37  ;;  %v569_v42 = vmul.f32 1.442695, %v564_v38  ;;  %v367_v43 = vpop.f32.mrf.mxu0  ;;  %v413_v44 = vpop.f32.mrf.mxu1 }
  0xe7   : > { %842 = vpow2.f32 %v567_v41  ;;  %v763_v45 = vpop.f32.mrf.mxu0  ;;  %v769_v46 = vpop.f32.mrf.mxu1 }
  0xe8   : > { %844 = vpow2.f32 %v569_v42 }
  0xe9   : > { %v456_v48 = vpop.f32.mrf.mxu0  ;;  %v502_v49 = vpop.f32.mrf.mxu1 }
  0xea   : > { %v532_v50 = vsel %vm1046_vm5, %v456_v48, -1e+09  ;;  %v533_v51 = vsel %vm1046_vm5, %v502_v49, -1e+09 }
  0xeb   : > { %v565_v52 = vsub.f32 %v532_v50, %v555_v36  ;;  %v566_v53 = vsub.f32 %v533_v51, %v562_v47  ;;  %v774_v54 = vpop.f32.mrf.mxu0  ;;  %v780_v55 = vpop.f32.mrf.mxu1 }
  0xed   : > { %v571_v56 = vmul.f32 1.442695, %v565_v52  ;;  %v573_v57 = vmul.f32 1.442695, %v566_v53  ;;  %v459_v58 = vpop.f32.mrf.mxu0  ;;  %v505_v59 = vpop.f32.mrf.mxu1 }
  0xef   : > { %846 = vpow2.f32 %v571_v56  ;;  %v775_v60 = vpop.f32.mrf.mxu0  ;;  %v781_v61 = vpop.f32.mrf.mxu1 }
  0xf0   : > { %848 = vpow2.f32 %v573_v57 }
  0xf4   : > { %v843_v62 = vpop.eup %842 }
  0xf5   : > { %v845_v63 = vpop.eup %844  ;;  %v575_v0 = vpack.c.bf16 %v843_v62, %v843_v62 }
  0xf6   : > { %v576_v1 = vpack.c.bf16 %v845_v63, %v845_v63 }
  0xf7   : > { %580 = vst.msk [vmem:[%s284_s30] sm:$0xf] %vm579_vm6, %v575_v0 }
  0xf8   : > { %581 = vst.msk [vmem:[%s284_s30 + $0x4] sm:$0xf] %vm579_vm6, %v576_v1 }
  0xfc   : > { %v847_v2 = vpop.eup %846 }
  0xfd   : > { %v849_v3 = vpop.eup %848  ;;  %v577_v4 = vpack.c.bf16 %v847_v2, %v847_v2 }
  0xfe   : > { %v578_v5 = vpack.c.bf16 %v849_v3, %v849_v3 }
  0xff   : > { %582 = vst.msk [vmem:[%s284_s30 + $0x8] sm:$0xf] %vm579_vm6, %v577_v4 }
 0x100   : > { %583 = vst.msk [vmem:[%s284_s30 + $0xc] sm:$0xf] %vm579_vm6, %v578_v5 }
 0x101   : > { %863 = shalt.err (!%p860_p5)
}
 0x102   : > { %s864_s14 = scalar_lea.hbm %s1065_s9, 256  ;;  %s868_s24 = scalar_lea.hbm %s1120_s4, 512 }
 0x103   : > { %p865_p6 = scmp.ne.s32.totalorder %s1065_s9, %s864_s14  ;;  %p869_p10 = scmp.lt.s32.totalorder %s1065_s9, %s1120_s4 }
 0x104   : > { %p870_p11 = scmp.lt.s32.totalorder %s868_s24, %s864_s14 }
 0x105   : > { %p866_p7 = pnand %p865_p6, %p999_p4 }
 0x106   : > { %p871_p12 = por %p870_p11, %p869_p10 }
 0x107   : > { %p867_p9 = pneg %p866_p7 }
 0x109   : > { %p872_p13 = pnand %p871_p12, %p867_p9 }
 0x10b   : > { %875 = shalt.err (!%p872_p13)
}
 0x10c   : > { %s932_s30 = smov 64   ;;  %s933_s5 = smov 4  }
 0x10d   : > { %782 = dma.vmem_to_hbm [thread:$0]  (%p999_p4), %s1067_s6, 256, %s1065_s9, %s1071_s18, %s932_s30, %s932_s30, %s933_s5  }
 0x10e PF: > { %p788_p0 = scmp.ge.s32.totalorder %s926_s20, 2  ;;  %s615_s7 = sand.u32 1, %s906_s15  }
 0x10f   : > { %s616_s8 = scalar_lea.sflag [#allocation3], %s615_s7 }
 0x110   : > { %p785_p1 = pnand %p788_p0, %p1006_p8 }
 0x112   : > { %p786_p2 = pneg %p785_p1 }
 0x114   : > { %901 = dma.done.wait (%p786_p2), %s616_s8, 256  }
 0x115   : > { %903 = vsyncadd (%p786_p2), %s616_s8, 4294967040  ;;  %s17_s20 = sadd.s32 1, %s926_s20   ;;  %s1125_s15 = smov %s910_s16 }
 0x116   : > { %p14_p3 = scmp.ge.s32.totalorder %s17_s20, 4   ;;  %s1126_s16 = smov %s914_s17 }
 0x117   : > { %s1127_s17 = smov %s1012_s28  ;;  %s1128_s18 = smov %s922_s19 }
 0x118   : > { %s1129_s19 = smov %s1131_s23  ;;  %16 = sbr.rel (!%p14_p3) target bundleno = 4 (0x4), region = 80 }
 0x11d   :  { %621 = vsyncpa [#allocation3], 1 }
 0x11e   :  { %623 = vsyncpa [#allocation3 + $0x1], 1 }

// kernel: gpt_forward.9
= control target key start
LH: loop header
LB: loop body
LE: loop exit
PB: predicated region body
PF: predicated region fallthrough
CT: control target
= control target key end

     0   :  { %v124_v0 = vmov 0.0   ;;  %vm125_vm0 = vmmov 0   ;;  %vm41_vm1 = vcmask 261120   ;;  %vm94_vm2 = vcmask 781312   ;;  %s167_s1 = inlined_call_operand.vmem [shape: bf16[32,96], index: 1, kind: input, shape index: {}]   ;;  %s168_s0 = inlined_call_operand.vmem [shape: f32[16,32], index: 0, kind: input, shape index: {}]   ;;  %s169_s2 = inlined_call_operand.vmem [shape: f32[1,96], index: 2, kind: input, shape index: {}]   ;;  %s170_s3 = inlined_call_operand.vmem [shape: bf16[16,96], index: 3, kind: output, shape index: {}]  }
   0x1   :  { %112 = vmatprep.subr.bf16.mxu0 %v124_v0  ;;  %v122_v1 = vld [vmem:[%s167_s1 + $0x8] sm:$0xff]   ;;  %116 = vmatprep.mubr.msk.bf16.mxu0 %vm125_vm0, %v124_v0  ;;  %v123_v2 = vld [vmem:[%s167_s1] sm:$0xff]  }
   0x2   :  { %113 = vmatpush3.bf16.msra.mxu0 %v122_v1  ;;  %v15_v3 = vld [vmem:[%s168_s0] sm:$0xff]  ;;  %v16_v4 = vld [vmem:[%s168_s0 + $0x8] sm:$0xff] }
   0x3   :  { %114 = vmatprep.subr.bf16.mxu0 %v124_v0  ;;  %v17_v5 = vpack.c.bf16 %v16_v4, %v15_v3  ;;  %v101_v6 = vld [vmem:[%s169_s2] ss:$0 sm:$0xff] }
   0x6   :  { %115 = vmatpush3.bf16.msra.mxu0 %v123_v2 }
   0x9   :  { %117 = vmatmul.mubr.msk.bf16.vlgmr.msra.gmra.mxu0 %vm41_vm1, %v17_v5 }
  0xc9   :  { %v79_v7 = vpop.f32.mrf.mxu0 }
  0xca   :  { %v80_v8 = vadd.f32 %v101_v6, %v79_v7 }
  0xcb   :  { %v118_v9 = vpop.f32.mrf.mxu0 }
  0xcc   :  { %v107_v10 = vpack.c.bf16 %v80_v8, %v80_v8 }
  0xcd   :  { %v82_v11 = vpop.f32.mrf.mxu0 }
  0xce   :  { %95 = vst.msk [vmem:[%s170_s3] sm:$0xf] %vm94_vm2, %v107_v10  ;;  %v83_v12 = vadd.f32 %v101_v6, %v82_v11 }
  0xcf   :  { %v119_v13 = vpop.f32.mrf.mxu0 }
  0xd0   :  { %v108_v14 = vpack.c.bf16 %v83_v12, %v83_v12 }
  0xd2   :  { %96 = vst.msk [vmem:[%s170_s3 + $0x4] sm:$0xf] %vm94_vm2, %v108_v14 }

// kernel: gpt_forward.12
= control target key start
LH: loop header
LB: loop body
LE: loop exit
PB: predicated region body
PF: predicated region fallthrough
CT: control target
= control target key end

     0   :  { %v463_v0 = vmov 0.0   ;;  %vm464_vm0 = vmmov 0   ;;  %vm74_vm1 = vcmask 261120   ;;  %vm285_vm2 = vcmask 523264   ;;  %s613_s2 = inlined_call_operand.vmem [shape: bf16[32,32], index: 2, kind: input, shape index: {}]   ;;  %s614_s1 = inlined_call_operand.vmem [shape: bf16[16,32], index: 1, kind: input, shape index: {}]   ;;  %s615_s3 = inlined_call_operand.vmem [shape: f32[1,32], index: 3, kind: input, shape index: {}]   ;;  %s616_s0 = inlined_call_operand.vmem [shape: f32[16,32], index: 0, kind: input, shape index: {}]   ;;  %s617_s6 = inlined_call_operand.vmem [shape: bf16[32,64], index: 6, kind: input, shape index: {}]   ;;  %s618_s4 = inlined_call_operand.vmem [shape: f32[1,32], index: 4, kind: input, shape index: {}]   ;;  %s619_s5 = inlined_call_operand.vmem [shape: f32[1,32], index: 5, kind: input, shape index: {}]   ;;  %s620_s8 = inlined_call_operand.vmem [shape: bf16[64,32], index: 8, kind: input, shape index: {}]   ;;  %s621_s7 = inlined_call_operand.vmem [shape: f32[1,64], index: 7, kind: input, shape index: {}]   ;;  %s622_s9 = inlined_call_operand.vmem [shape: f32[1,32], index: 9, kind: input, shape index: {}]   ;;  %s623_s10 = inlined_call_operand.vmem [shape: f32[1,32], index: 10, kind: input, shape index: {}]   ;;  %s624_s11 = inlined_call_operand.vmem [shape: f32[1,32], index: 11, kind: input, shape index: {}]   ;;  %s625_s12 = inlined_call_operand.vmem [shape: f32[16,32], index: 12, kind: output, shape index: {}]  }
   0x1   :  { %412 = vmatprep.subr.bf16.mxu1 %v463_v0  ;;  %v442_v1 = vld [vmem:[%s613_s2 + $0x8] sm:$0xff]   ;;  %416 = vmatprep.mubr.msk.bf16.mxu1 %vm464_vm0, %v463_v0  ;;  %v443_v2 = vld [vmem:[%s613_s2] sm:$0xff]   ;;  %v447_v46 = vld [vmem:[%s620_s8 + $0x18] sm:$0xff]  }
   0x2   :  { %428 = vmatprep.subr.bf16.mxu0 %v463_v0  ;;  %436 = vmatprep.mubr.msk.bf16.mxu0 %vm464_vm0, %v463_v0  ;;  %v444_v3 = vld [vmem:[%s614_s1] sm:$0xff]   ;;  %v43_v11 = vld [vmem:[%s616_s0 + $0x8] sm:$0xff]  ;;  %v448_v47 = vld [vmem:[%s620_s8 + $0x10] sm:$0xff]  }
   0x3   :  { %413 = vmatpush3.bf16.msra.mxu1 %v442_v1  ;;  %v382_v4 = vld [vmem:[%s615_s3] ss:$0 sm:$0xff]  ;;  %v445_v27 = vld [vmem:[%s617_s6 + $0x8] sm:$0xff]   ;;  %429 = vmatpush3.bf16.msra.mxu0 %v447_v46 }
   0x4   :  { %414 = vmatprep.subr.bf16.mxu1 %v463_v0  ;;  %v42_v6 = vld [vmem:[%s616_s0] sm:$0xff]  ;;  %430 = vmatprep.subr.bf16.mxu0 %v463_v0  ;;  %v449_v48 = vld [vmem:[%s620_s8 + $0x8] sm:$0xff]  }
   0x5   :  { %v446_v28 = vld [vmem:[%s617_s6] sm:$0xff]  }
   0x6   :  { %v387_v37 = vld [vmem:[%s618_s4] ss:$0 sm:$0xff] }
   0x7   :  { %415 = vmatpush3.bf16.msra.mxu1 %v443_v2  ;;  %v388_v41 = vld [vmem:[%s619_s5] ss:$0 sm:$0xff]  ;;  %431 = vmatpush3.bf16.msra.mxu0 %v448_v47 }
   0x8   :  { %420 = vmatprep.subr.bf16.mxu1 %v463_v0  ;;  %432 = vmatprep.subr.bf16.mxu0 %v463_v0  ;;  %v450_v49 = vld [vmem:[%s620_s8] sm:$0xff]  }
   0x9   :  { %v389_v50 = vld [vmem:[%s621_s7] ss:$0 sm:$0xff] }
   0xa   :  { %417 = vmatmul.mubr.msk.bf16.vlgmr.msra.gmra.mxu1 %vm74_vm1, %v444_v3 }
   0xb   :  { %424 = vmatprep.mubr.msk.bf16.mxu1 %vm464_vm0, %v463_v0  ;;  %421 = vmatpush3.bf16.msra.mxu1 %v445_v27 }
   0xc   :  { %422 = vmatprep.subr.bf16.mxu1 %v463_v0  ;;  %433 = vmatpush3.bf16.msra.mxu0 %v449_v48 }
   0xd   :  { %434 = vmatprep.subr.bf16.mxu0 %v463_v0 }
   0xf   :  { %423 = vmatpush3.bf16.msra.mxu1 %v446_v28 }
  0x10   :  { %435 = vmatpush3.bf16.msra.mxu0 %v450_v49 }
  0xca   :  { %v112_v5 = vpop.f32.mrf.mxu1 }
  0xcb   :  { %v113_v7 = vadd.f32 %v382_v4, %v112_v5 }
  0xcc   :  { %v418_v8 = vpop.f32.mrf.mxu1 }
  0xcd   :  { %v119_v9 = vadd.f32 %v113_v7, %v42_v6 }
  0xce   :  { %v115_v10 = vpop.f32.mrf.mxu1 }
  0xcf   :  { %v116_v12 = vadd.f32 %v382_v4, %v115_v10  ;;  %v123_v13 = vsel %vm74_vm1, %v119_v9, 0.0  ;;  %v393_v4 = vld [vmem:[%s622_s9] ss:$0 sm:$0xff] }
  0xd0   :  { %v419_v14 = vpop.f32.mrf.mxu1  ;;  %124 = vadd.xlane.f32.xlu0 %v123_v13 }
  0xd1   :  { %v120_v15 = vadd.f32 %v116_v12, %v43_v11 }
  0xd3   :  { %v126_v16 = vsel %vm74_vm1, %v120_v15, 0.0 }
  0xd4   :  { %127 = vadd.xlane.f32.xlu0 %v126_v16 }
 0x159   :  { %v125_v17 = vpop.xlane.xlu0 %124 }
 0x15a   :  { %v130_v18 = vmul.f32 0.03125, %v125_v17 }
 0x15c   :  { %v132_v19 = vsub.f32 %v119_v9, %v130_v18 }
 0x15d   :  { %v128_v20 = vpop.xlane.xlu0 %127 }
 0x15e   :  { %v131_v21 = vmul.f32 0.03125, %v128_v20  ;;  %v134_v22 = vmul.f32 %v132_v19, %v132_v19 }
 0x160   :  { %v133_v23 = vsub.f32 %v120_v15, %v131_v21  ;;  %v136_v24 = vsel %vm74_vm1, %v134_v22, 0.0 }
 0x161   :  { %137 = vadd.xlane.f32.xlu1 %v136_v24 }
 0x162   :  { %v135_v25 = vmul.f32 %v133_v23, %v133_v23 }
 0x164   :  { %v139_v26 = vsel %vm74_vm1, %v135_v25, 0.0 }
 0x165   :  { %140 = vadd.xlane.f32.xlu1 %v139_v26 }
 0x1ea   :  { %v138_v29 = vpop.xlane.xlu1 %137 }
 0x1eb   :  { %v142_v30 = vmul.f32 0.03125, %v138_v29 }
 0x1ed   :  { %v144_v31 = vadd.f32 1e-05, %v142_v30 }
 0x1ee   :  { %v141_v32 = vpop.xlane.xlu1 %140 }
 0x1ef   :  { %451 = vrsqrt.f32 %v144_v31  ;;  %v143_v33 = vmul.f32 0.03125, %v141_v32  ;;  %v399_v32 = vld [vmem:[%s623_s10] ss:$0 sm:$0xff] }
 0x1f1   :  { %v145_v34 = vadd.f32 1e-05, %v143_v33 }
 0x1f3   :  { %453 = vrsqrt.f32 %v145_v34  ;;  %v400_v34 = vld [vmem:[%s624_s11] ss:$0 sm:$0xff] }
 0x1fc   :  { %v452_v35 = vpop.eup %451 }
 0x1fd   :  { %v148_v36 = vmul.f32 %v452_v35, %v132_v19 }
 0x1ff   :  { %v156_v40 = vmul.f32 %v387_v37, %v148_v36 }
 0x200   :  { %v454_v38 = vpop.eup %453 }
 0x201   :  { %v149_v39 = vmul.f32 %v454_v38, %v133_v23  ;;  %v164_v43 = vadd.f32 %v388_v41, %v156_v40 }
 0x203   :  { %v157_v42 = vmul.f32 %v387_v37, %v149_v39 }
 0x205   :  { %v165_v44 = vadd.f32 %v388_v41, %v157_v42 }
 0x207   :  { %v166_v45 = vpack.c.bf16 %v165_v44, %v164_v43 }
 0x209   :  { %425 = vmatmul.mubr.msk.bf16.vlgmr.msra.gmra.mxu1 %vm74_vm1, %v166_v45 }
 0x2c9   :  { %v227_v51 = vpop.f32.mrf.mxu1 }
 0x2ca   :  { %v228_v52 = vadd.f32 %v389_v50, %v227_v51 }
 0x2cb   :  { %v426_v53 = vpop.f32.mrf.mxu1 }
 0x2cc   :  { %v237_v54 = vmul.f32 0.70710677, %v228_v52  ;;  %v234_v62 = vmul.f32 0.5, %v228_v52 }
 0x2cd   :  { %v230_v55 = vpop.f32.mrf.mxu1 }
 0x2ce   :  { %455 = verf.f32 %v237_v54  ;;  %v231_v56 = vadd.f32 %v389_v50, %v230_v55 }
 0x2cf   :  { %v427_v57 = vpop.f32.mrf.mxu1 }
 0x2d0   :  { %v238_v58 = vmul.f32 0.70710677, %v231_v56  ;;  %v235_v63 = vmul.f32 0.5, %v231_v56 }
 0x2d2   :  { %457 = verf.f32 %v238_v58 }
 0x2db   :  { %v456_v59 = vpop.eup %455 }
 0x2dc   :  { %v241_v60 = vadd.f32 1.0, %v456_v59 }
 0x2de   :  { %v243_v1 = vmul.f32 %v241_v60, %v234_v62 }
 0x2df   :  { %v458_v61 = vpop.eup %457 }
 0x2e0   :  { %v242_v0 = vadd.f32 1.0, %v458_v61 }
 0x2e2   :  { %v244_v2 = vmul.f32 %v242_v0, %v235_v63 }
 0x2e4   :  { %v245_v3 = vpack.c.bf16 %v244_v2, %v243_v1 }
 0x2e6   :  { %437 = vmatmul.mubr.msk.bf16.vlgmr.msra.gmra.mxu0 %vm285_vm2, %v245_v3 }
 0x3a6   :  { %v323_v5 = vpop.f32.mrf.mxu0 }
 0x3a7   :  { %v324_v6 = vadd.f32 %v393_v4, %v323_v5 }
 0x3a8   :  { %v438_v7 = vpop.f32.mrf.mxu0 }
 0x3a9   :  { %v330_v8 = vadd.f32 %v324_v6, %v164_v43 }
 0x3aa   :  { %v326_v9 = vpop.f32.mrf.mxu0 }
 0x3ab   :  { %v327_v10 = vadd.f32 %v393_v4, %v326_v9  ;;  %v334_v11 = vsel %vm74_vm1, %v330_v8, 0.0 }
 0x3ac   :  { %335 = vadd.xlane.f32.xlu0 %v334_v11  ;;  %v439_v12 = vpop.f32.mrf.mxu0 }
 0x3ad   :  { %v331_v13 = vadd.f32 %v327_v10, %v165_v44 }
 0x3af   :  { %v337_v14 = vsel %vm74_vm1, %v331_v13, 0.0 }
 0x3b0   :  { %338 = vadd.xlane.f32.xlu1 %v337_v14 }
 0x435   :  { %v336_v15 = vpop.xlane.xlu0 %335 }
 0x436   :  { %v340_v16 = vmul.f32 0.03125, %v336_v15 }
 0x438   :  { %v342_v17 = vsub.f32 %v330_v8, %v340_v16 }
 0x439   :  { %v339_v18 = vpop.xlane.xlu1 %338 }
 0x43a   :  { %v341_v19 = vmul.f32 0.03125, %v339_v18  ;;  %v344_v20 = vmul.f32 %v342_v17, %v342_v17 }
 0x43c   :  { %v343_v21 = vsub.f32 %v331_v13, %v341_v19  ;;  %v346_v22 = vsel %vm74_vm1, %v344_v20, 0.0 }
 0x43d   :  { %347 = vadd.xlane.f32.xlu0 %v346_v22 }
 0x43e   :  { %v345_v23 = vmul.f32 %v343_v21, %v343_v21 }
 0x440   :  { %v349_v24 = vsel %vm74_vm1, %v345_v23, 0.0 }
 0x441   :  { %350 = vadd.xlane.f32.xlu1 %v349_v24 }
 0x4c6   :  { %v348_v25 = vpop.xlane.xlu0 %347 }
 0x4c7   :  { %v352_v26 = vmul.f32 0.03125, %v348_v25 }
 0x4c9   :  { %v354_v27 = vadd.f32 1e-05, %v352_v26 }
 0x4ca   :  { %v351_v28 = vpop.xlane.xlu1 %350 }
 0x4cb   :  { %459 = vrsqrt.f32 %v354_v27  ;;  %v353_v29 = vmul.f32 0.03125, %v351_v28 }
 0x4cd   :  { %v355_v30 = vadd.f32 1e-05, %v353_v29 }
 0x4cf   :  { %461 = vrsqrt.f32 %v355_v30 }
 0x4d8   :  { %v460_v31 = vpop.eup %459 }
 0x4d9   :  { %v358_v33 = vmul.f32 %v460_v31, %v342_v17 }
 0x4db   :  { %v366_v35 = vmul.f32 %v399_v32, %v358_v33 }
 0x4dc   :  { %v462_v36 = vpop.eup %461 }
 0x4dd   :  { %v374_v37 = vadd.f32 %v400_v34, %v366_v35  ;;  %v359_v38 = vmul.f32 %v462_v36, %v343_v21 }
 0x4df   :  { %376 = vst.msk [vmem:[%s625_s12] sm:$0xff] %vm74_vm1, %v374_v37  ;;  %v367_v39 = vmul.f32 %v399_v32, %v359_v38 }
 0x4e1   :  { %v375_v40 = vadd.f32 %v400_v34, %v367_v39 }
 0x4e3   :  { %377 = vst.msk [vmem:[%s625_s12 + $0x8] sm:$0xff] %vm74_vm1, %v375_v40 }

// kernel: gpt_forward.10
= control target key start
LH: loop header
LB: loop body
LE: loop exit
PB: predicated region body
PF: predicated region fallthrough
CT: control target
= control target key end

     0   :  { %s1394_s18 = smov 0   ;;  %s1396_s19 = smov 0   ;;  %s1593_s0 = inlined_call_operand.vmem [shape: bf16[2,4,8,8], index: 0, kind: input, shape index: {}]   ;;  %s1594_s1 = inlined_call_operand.vmem [shape: bf16[2,4,8,8], index: 1, kind: input, shape index: {}]   ;;  %s1595_s2 = inlined_call_operand.vmem [shape: bf16[2,4,8,8], index: 2, kind: input, shape index: {}]   ;;  %s1596_s3 = inlined_call_operand.vmem [shape: s32[2,1,8], index: 3, kind: input, shape index: {}]   ;;  %s1597_s4 = inlined_call_operand.vmem [shape: bf16[2,8,32], index: 4, kind: output, shape index: {0}]   ;;  %s1598_s5 = inlined_call_operand.vmem [shape: f32[2,4,8], index: 5, kind: output, shape index: {1}]  }
   0x1   :  { %s1398_s20 = smov 0  }
   0x2 LB: > { %s35_s21 = sadd.s32 1, %s1351_s19  ;;  %p1202_p0 = scmp.ge.s32.totalorder %s1355_s20, 1  ;;  %s1355_s20 = sphi %s1398_s20, %s16_s20   ;;  %s1351_s19 = sphi %s1396_s19, %s1602_s19   ;;  %s1347_s18 = sphi %s1394_s18, %s1601_s18  }
   0x3   : > { %p37_p1 = scmp.ge.s32.totalorder %s35_s21, 2  ;;  %p261_p2 = scmp.lt.s32.totalorder %s1355_s20, 3 }
   0x5   : > { %s1604_s21 = smov (%p37_p1, %s35_s21), 0  ;;  %p262_p3 = pnand %p1202_p0, %p261_p2 }
   0x6   : > { %p323_p4 = scmp.lt.s32.totalorder (!%p262_p3), %s1347_s18, 1  ;;  %s1361_s14 = smov (!%p262_p3), 8  }
   0x7   : > { %265 = sbr.rel (%p262_p3) target bundleno = 926 (0x39e), region = 36  ;;  %s1362_s15 = smov (!%p262_p3), 16  }
   0x8   : > { %s1363_s16 = smov (!%p262_p3), 24  }
   0xc   : > { %vm375_vm0 = vcmask 64512   ;;  %v1357_v0 = vmov 0.0   ;;  %s1606_s18 = smov (!%p323_p4, %s1347_s18), 1  ;;  %vm1358_vm1 = vmmov 0   ;;  %v578_v13 = vlaneseq }
   0xd   : > { %1240 = vmatprep.subr.bf16.mxu0 %v1357_v0  ;;  %1246 = vmatprep.subr.bf16.mxu1 %v1357_v0  ;;  %376 = vst.msk [vmem:[#allocation4] sm:$0xff] %vm375_vm0, %v1357_v0  ;;  %377 = vst.msk [vmem:[#allocation4 + $0x8] sm:$0xff] %vm375_vm0, %v1357_v0  ;;  %s1429_s22 = sshll.u32 %s1606_s18, 4  ;;  %s352_s6 = scalar_lea.vmem %s1596_s3, %s1606_s18  ;;  %v1359_v17 = vmov 0   ;;  %vm372_vm6 = vcmask 60416   ;;  %v1360_v46 = vmov -inf  }
   0xe   : > { %378 = vst.msk [vmem:[#allocation4 + $0x10] sm:$0xff] %vm375_vm0, %v1357_v0  ;;  %379 = vst.msk [vmem:[#allocation4 + $0x18] sm:$0xff] %vm375_vm0, %v1357_v0  ;;  %1242 = vmatprep.mubr.msk.bf16.mxu0 %vm1358_vm1, %v1357_v0  ;;  %1248 = vmatprep.mubr.msk.bf16.mxu1 %vm1358_vm1, %v1357_v0  ;;  %s338_s25 = scalar_lea.vmem %s1594_s1, %s1429_s22  ;;  %s330_s28 = scalar_lea.vmem %s1593_s0, %s1429_s22  ;;  %v588_v14 = vld [vmem:[%s352_s6] sm:$0x1]  ;;  %v1463_v15 = vshrl.u32 %v578_v13, 7  ;;  %v584_v19 = vand.u32 127, %v578_v13 }
   0xf   : > { %v384_v1 = vld [vmem:[%s338_s25] sm:$0xf]  ;;  %v385_v2 = vld [vmem:[%s338_s25 + $0x4] sm:$0xf]  ;;  %v386_v5 = vld [vmem:[%s338_s25 + $0x8] sm:$0xf]  ;;  %s346_s9 = scalar_lea.vmem %s1595_s2, %s1429_s22 }
  0x10   : > { %v397_v3 = vsel %vm375_vm0, %v384_v1, 0  ;;  %v443_v4 = vsel %vm375_vm0, %v385_v2, 0  ;;  %v387_v6 = vld [vmem:[%s338_s25 + $0xc] sm:$0xf]  ;;  %v380_v7 = vld [vmem:[%s330_s28] sm:$0xf]  ;;  %vm587_vm3 = vcmp.le.s32.totalorder %v584_v19, %v1463_v15  ;;  %v1502_v49 = vsub.s32 %v584_v19, %v1463_v15 }
  0x11   : > { %1241 = vmatpush3.bf16.xpose.msra.mxu0 %v397_v3  ;;  %1247 = vmatpush3.bf16.xpose.msra.mxu1 %v443_v4  ;;  %v381_v8 = vld [vmem:[%s330_s28 + $0x4] sm:$0xf]  ;;  %v489_v9 = vsel %vm375_vm0, %v386_v5, 0  ;;  %v535_v10 = vsel %vm375_vm0, %v387_v6, 0  ;;  %v382_v11 = vld [vmem:[%s330_s28 + $0x8] sm:$0xf] }
  0x12   : > { %1252 = vmatprep.subr.bf16.mxu0 %v1357_v0  ;;  %1258 = vmatprep.subr.bf16.mxu1 %v1357_v0  ;;  %v383_v12 = vld [vmem:[%s330_s28 + $0xc] sm:$0xf]  ;;  %vm589_vm2 = vcmp.ne.s32.totalorder %v588_v14, 0  ;;  %v1466_v16 = vsub.s32 0, %v1463_v15  ;;  %373 = vst.msk [vmem:[#allocation2] sm:$0xf] %vm372_vm6, %v1360_v46 }
  0x13   : > { %v590_v18 = vsel %vm589_vm2, 1, %v1359_v17  ;;  %374 = vst.msk [vmem:[#allocation3] sm:$0xf] %vm372_vm6, %v1357_v0  ;;  %vm636_vm7 = vcmask 1041409   ;;  %vm638_vm8 = vcmask 1042434   ;;  %vm640_vm9 = vcmask 1043459  }
  0x14   : > { %v594_v20 = vrot.slane %v590_v18, %v1466_v16  ;;  %v1511_v59 = vsub.s32 1, %v1463_v15  ;;  %v1518_v2 = vsub.s32 2, %v1463_v15  ;;  %vm771_vm10 = vcmask 1043456   ;;  %v388_v3 = vld [vmem:[%s346_s9] sm:$0xf]  ;;  %s1209_s10 = sshll.u32 %s1606_s18, 2 }
  0x15   : > { %v773_v4 = vsel %vm771_vm10, %v388_v3, 0  ;;  %v389_v5 = vld [vmem:[%s346_s9 + $0x4] sm:$0xf]  ;;  %s366_s13 = scalar_lea.vmem %s1598_s5, %s1209_s10  ;;  %vm1016_vm11 = vcmask 130048   ;;  %vm1018_vm12 = vcmask 195584   ;;  %s359_s23 = scalar_lea.vmem %s1597_s4, %s1209_s10  ;;  %vm1021_vm13 = vcmask 257024  }
  0x16   : > { %vm595_vm4 = vcmp.eq.s32.totalorder %v594_v20, 1 }
  0x17   : > { %vm1470_vm5 = vmand %vm587_vm3, %vm595_vm4 }
  0x18   : > { %1243 = vmatmul.mubr.msk.bf16.vlgmr.msra.gmra.mxu0 %vm375_vm0, %v380_v7  ;;  %1249 = vmatmul.mubr.msk.bf16.vlgmr.msra.gmra.mxu1 %vm375_vm0, %v381_v8  ;;  %v1527_v7 = vsub.s32 3, %v1463_v15  ;;  %v819_v8 = vsel %vm771_vm10, %v389_v5, 0 }
  0x19   : > { %1253 = vmatpush3.bf16.xpose.msra.mxu0 %v489_v9  ;;  %1259 = vmatpush3.bf16.xpose.msra.mxu1 %v535_v10  ;;  %v603_v56 = vld [vmem:[#allocation2] sm:$0xf]  ;;  %v390_v10 = vld [vmem:[%s346_s9 + $0x8] sm:$0xf] }
  0x1a   : > { %1254 = vmatprep.mubr.msk.bf16.mxu0 %vm1358_vm1, %v1357_v0  ;;  %1260 = vmatprep.mubr.msk.bf16.mxu1 %vm1358_vm1, %v1357_v0 }
  0x1b   : > { %1264 = vmatprep.subr.bf16.mxu0 %v1357_v0  ;;  %1270 = vmatprep.subr.bf16.mxu1 %v1357_v0 }
  0x20   : > { %1255 = vmatmul.mubr.msk.bf16.vlgmr.msra.gmra.mxu0 %vm375_vm0, %v382_v11  ;;  %1261 = vmatmul.mubr.msk.bf16.vlgmr.msra.gmra.mxu1 %vm375_vm0, %v383_v12  ;;  %v391_v11 = vld [vmem:[%s346_s9 + $0xc] sm:$0xf]  ;;  %v865_v12 = vsel %vm771_vm10, %v390_v10, 0 }
  0x21   : > { %1266 = vmatprep.mubr.msk.bf16.mxu0 %vm1358_vm1, %v1357_v0  ;;  %1272 = vmatprep.mubr.msk.bf16.mxu1 %vm1358_vm1, %v1357_v0  ;;  %v911_v13 = vsel %vm771_vm10, %v391_v11, 0 }
  0x22   : > { %1265 = vmatpush3.bf16.msra.mxu0 %v773_v4  ;;  %1271 = vmatpush3.bf16.msra.mxu1 %v819_v8 }
  0x23   : > { %1276 = vmatprep.subr.bf16.mxu0 %v1357_v0  ;;  %1282 = vmatprep.subr.bf16.mxu1 %v1357_v0 }
  0xd8   : > { %v433_v22 = vpop.f32.mrf.mxu0  ;;  %v479_v23 = vpop.f32.mrf.mxu1 }
  0xd9   : > { %v1476_v24 = vsel %vm1470_vm5, %v433_v22, -1e+09  ;;  %v1480_v25 = vsel %vm1470_vm5, %v479_v23, -1e+09 }
  0xda   : > { %v1244_v26 = vpop.f32.mrf.mxu0  ;;  %v1250_v27 = vpop.f32.mrf.mxu1  ;;  %v604_v28 = vsel %vm375_vm0, %v1476_v24, -inf  ;;  %v607_v31 = vsel %vm375_vm0, %v1480_v25, -inf }
  0xdb   : > { %605 = vmax.xlane.f32.xlu0 %v604_v28 }
  0xdc   : > { %v436_v29 = vpop.f32.mrf.mxu0  ;;  %v482_v30 = vpop.f32.mrf.mxu1 }
  0xde   : > { %v1245_v32 = vpop.f32.mrf.mxu0  ;;  %v1251_v33 = vpop.f32.mrf.mxu1 }
  0xdf   : > { %608 = vmax.xlane.f32.xlu0 %v607_v31 }
  0xe0   : > { %v525_v34 = vpop.f32.mrf.mxu0  ;;  %v571_v35 = vpop.f32.mrf.mxu1 }
  0xe1   : > { %v1488_v36 = vsel %vm1470_vm5, %v525_v34, -1e+09  ;;  %v1492_v37 = vsel %vm1470_vm5, %v571_v35, -1e+09 }
  0xe2   : > { %v1256_v38 = vpop.f32.mrf.mxu0  ;;  %v1262_v39 = vpop.f32.mrf.mxu1  ;;  %v610_v40 = vsel %vm375_vm0, %v1488_v36, -inf  ;;  %v613_v43 = vsel %vm375_vm0, %v1492_v37, -inf }
  0xe3   : > { %611 = vmax.xlane.f32.xlu1 %v610_v40 }
  0xe4   : > { %v528_v41 = vpop.f32.mrf.mxu0  ;;  %v574_v42 = vpop.f32.mrf.mxu1 }
  0xe6   : > { %v1257_v44 = vpop.f32.mrf.mxu0  ;;  %v1263_v45 = vpop.f32.mrf.mxu1 }
  0xe7   : > { %614 = vmax.xlane.f32.xlu1 %v613_v43 }
 0x164   : > { %v606_v47 = vpop.xlane.xlu0 %605 }
 0x165   : > { %v623_v53 = vrot.slane %v606_v47, %v1502_v49 }
 0x168   : > { %v609_v48 = vpop.xlane.xlu0 %608 }
 0x169   : > { %v627_v51 = vrot.slane %v609_v48, %v1502_v49 }
 0x16b   : > { %v637_v55 = vsel %vm636_vm7, %v627_v51, %v623_v53 }
 0x16c   : > { %v612_v50 = vpop.xlane.xlu1 %611 }
 0x16d   : > { %v631_v52 = vrot.slane %v612_v50, %v1502_v49  ;;  %v687_v50 = vld [vmem:[#allocation3] sm:$0xf] }
 0x16f   : > { %v639_v58 = vsel %vm638_vm8, %v631_v52, %v637_v55 }
 0x170   : > { %v615_v54 = vpop.xlane.xlu1 %614 }
 0x171   : > { %v635_v57 = vrot.slane %v615_v54, %v1502_v49 }
 0x173   : > { %v641_v60 = vsel %vm640_vm9, %v635_v57, %v639_v58 }
 0x174   : > { %v643_v61 = vmax.f32 %v603_v56, %v641_v60 }
 0x176   : > { %v644_v62 = vsub.f32 %v603_v56, %v643_v61  ;;  %961 = vst.msk [vmem:[#allocation2] sm:$0xf] %vm372_vm6, %v643_v61  ;;  %v657_v63 = vrot.slane %v643_v61, %v1511_v59  ;;  %v650_v1 = vrot.slane %v643_v61, %v1466_v16  ;;  %v664_v6 = vrot.slane %v643_v61, %v1518_v2 }
 0x177   : > { %v671_v9 = vrot.slane %v643_v61, %v1527_v7 }
 0x178   : > { %659 = vbcast.lane.b32.xlu1 %v657_v63, 256  ;;  %652 = vbcast.lane.b32.xlu0 %v650_v1, 256  ;;  %v645_v29 = vmul.f32 1.442695, %v644_v62 }
 0x17c   : > { %666 = vbcast.lane.b32.xlu1 %v664_v6, 256 }
 0x17d   : > { %v1023_v3 = vld [vmem:[#allocation2] sm:$0xf] }
 0x180   : > { %673 = vbcast.lane.b32.xlu1 %v671_v9, 256 }
 0x1ea   : > { %v660_v14 = vpop.permute.xlu1 %659  ;;  %v653_v15 = vpop.permute.xlu0 %652 }
 0x1eb   : > { %v676_v17 = vsub.f32 %v1480_v25, %v660_v14  ;;  %v675_v18 = vsub.f32 %v1476_v24, %v653_v15 }
 0x1ed   : > { %v681_v19 = vmul.f32 1.442695, %v676_v17  ;;  %v679_v20 = vmul.f32 1.442695, %v675_v18  ;;  %v759_v17 = vld [vmem:[#allocation4 + $0x18] sm:$0xff] }
 0x1ee   : > { %v667_v21 = vpop.permute.xlu1 %666 }
 0x1ef   : > { %1319 = vpow2.f32 %v681_v19  ;;  %v677_v22 = vsub.f32 %v1488_v36, %v667_v21  ;;  %v758_v19 = vld [vmem:[#allocation4 + $0x10] sm:$0xff] }
 0x1f0   : > { %1321 = vpow2.f32 %v679_v20 }
 0x1f1   : > { %v683_v23 = vmul.f32 1.442695, %v677_v22 }
 0x1f2   : > { %v674_v26 = vpop.permute.xlu1 %673 }
 0x1f3   : > { %1323 = vpow2.f32 %v683_v23  ;;  %v678_v27 = vsub.f32 %v1492_v37, %v674_v26 }
 0x1f5   : > { %v685_v28 = vmul.f32 1.442695, %v678_v27 }
 0x1f7   : > { %1325 = vpow2.f32 %v685_v28 }
 0x1f8   : > { %1327 = vpow2.f32 %v645_v29 }
 0x1fc   : > { %v1320_v30 = vpop.eup %1319 }
 0x1fd   : > { %v1322_v31 = vpop.eup %1321  ;;  %v692_v24 = vsel %vm375_vm0, %v1320_v30, 0.0  ;;  %v765_v25 = vpack.c.bf16 %v1320_v30, %v1320_v30 }
 0x1fe   : > { %693 = vadd.xlane.f32.xlu1 %v692_v24  ;;  %v689_v32 = vsel %vm375_vm0, %v1322_v31, 0.0  ;;  %v764_v33 = vpack.c.bf16 %v1322_v31, %v1322_v31 }
 0x1ff   : > { %690 = vadd.xlane.f32.xlu0 %v689_v32  ;;  %1273 = vmatmul.mubr.msk.bf16.vlgmr.msra.gmra.mxu1 %vm375_vm0, %v765_v25 }
 0x200   : > { %v1324_v34 = vpop.eup %1323  ;;  %1267 = vmatmul.mubr.msk.bf16.vlgmr.msra.gmra.mxu0 %vm375_vm0, %v764_v33  ;;  %1283 = vmatpush3.bf16.msra.mxu1 %v911_v13 }
 0x201   : > { %v695_v35 = vsel %vm375_vm0, %v1324_v34, 0.0  ;;  %1277 = vmatpush3.bf16.msra.mxu0 %v865_v12  ;;  %1278 = vmatprep.mubr.msk.bf16.mxu0 %vm1358_vm1, %v1357_v0  ;;  %v766_v39 = vpack.c.bf16 %v1324_v34, %v1324_v34 }
 0x202   : > { %1284 = vmatprep.mubr.msk.bf16.mxu1 %vm1358_vm1, %v1357_v0 }
 0x203   : > { %696 = vadd.xlane.f32.xlu0 %v695_v35 }
 0x204   : > { %v1326_v36 = vpop.eup %1325 }
 0x205   : > { %v698_v37 = vsel %vm375_vm0, %v1326_v36, 0.0  ;;  %v767_v38 = vpack.c.bf16 %v1326_v36, %v1326_v36  ;;  %v1328_v40 = vpop.eup %1327 }
 0x206   : > { %v745_v41 = vrot.slane %v1328_v40, %v1518_v2  ;;  %v752_v42 = vrot.slane %v1328_v40, %v1527_v7  ;;  %v738_v0 = vrot.slane %v1328_v40, %v1511_v59  ;;  %v688_v55 = vmul.f32 %v1328_v40, %v687_v50 }
 0x207   : > { %699 = vadd.xlane.f32.xlu0 %v698_v37  ;;  %1285 = vmatmul.mubr.msk.bf16.vlgmr.msra.gmra.mxu1 %vm375_vm0, %v767_v38  ;;  %v731_v5 = vrot.slane %v1328_v40, %v1466_v16  ;;  %v756_v40 = vld [vmem:[#allocation4] sm:$0xff] }
 0x208   : > { %1279 = vmatmul.mubr.msk.bf16.vlgmr.msra.gmra.mxu0 %vm375_vm0, %v766_v39 }
 0x20f   : > { %747 = vbcast.lane.b32.xlu1 %v745_v41, 256 }
 0x213   : > { %754 = vbcast.lane.b32.xlu1 %v752_v42, 256 }
 0x21d   : > { %740 = vbcast.lane.b32.xlu0 %v738_v0, 256 }
 0x287   : > { %v694_v44 = vpop.xlane.xlu1 %693 }
 0x288   : > { %v691_v43 = vpop.xlane.xlu0 %690  ;;  %v712_v46 = vrot.slane %v694_v44, %v1502_v49 }
 0x289   : > { %v708_v47 = vrot.slane %v691_v43, %v1502_v49 }
 0x28b   : > { %v721_v52 = vsel %vm636_vm7, %v712_v46, %v708_v47  ;;  %v748_v9 = vpop.permute.xlu1 %747 }
 0x28c   : > { %v697_v45 = vpop.xlane.xlu0 %696  ;;  %v762_v23 = vmul.f32 %v758_v19, %v748_v9 }
 0x28d   : > { %v716_v48 = vrot.slane %v697_v45, %v1502_v49 }
 0x28f   : > { %v722_v54 = vsel %vm638_vm8, %v716_v48, %v721_v52 }
 0x290   : > { %v700_v51 = vpop.xlane.xlu0 %699 }
 0x291   : > { %v720_v53 = vrot.slane %v700_v51, %v1502_v49 }
 0x293   : > { %v723_v56 = vsel %vm640_vm9, %v720_v53, %v722_v54 }
 0x294   : > { %v725_v57 = vadd.f32 %v723_v56, %v688_v55  ;;  %v741_v8 = vpop.permute.xlu0 %740 }
 0x296   : > { %727 = vst.msk [vmem:[#allocation3] sm:$0xf] %vm372_vm6, %v725_v57 }
 0x29d   : > { %v965_v58 = vld [vmem:[#allocation3] sm:$0xf] }
 0x29e   : > { %v1024_v60 = vld [vmem:[#allocation3] sm:$0xf]  ;;  %1329 = vrcp.f32 %v965_v58 }
 0x29f   : > { %1331 = vlog2.f32 %v1024_v60 }
 0x2ab   : > { %v1330_v61 = vpop.eup %1329 }
 0x2ac   : > { %v1332_v62 = vpop.eup %1331  ;;  %v988_v63 = vrot.slane %v1330_v61, %v1518_v2  ;;  %v981_v49 = vrot.slane %v1330_v61, %v1511_v59  ;;  %v995_v6 = vrot.slane %v1330_v61, %v1527_v7  ;;  %v974_v59 = vrot.slane %v1330_v61, %v1466_v16  ;;  %v757_v2 = vld [vmem:[#allocation4 + $0x8] sm:$0xff]  ;;  %v755_v7 = vpop.permute.xlu1 %754 }
 0x2ad   : > { %v1026_v1 = vmul.f32 0.6931472, %v1332_v62  ;;  %v761_v10 = vmul.f32 %v757_v2, %v741_v8  ;;  %v763_v22 = vmul.f32 %v759_v17, %v755_v7 }
 0x2ae   : > { %990 = vbcast.lane.b32.xlu0 %v988_v63, 256  ;;  %983 = vbcast.lane.b32.xlu1 %v981_v49, 256 }
 0x2af   : > { %v1027_v4 = vadd.f32 %v1026_v1, %v1023_v3 }
 0x2b1   : > { %1028 = vst.msk [vmem:[%s366_s13] sm:$0xf] %vm372_vm6, %v1027_v4 }
 0x2b2   : > { %733 = vbcast.lane.b32.xlu0 %v731_v5, 256  ;;  %997 = vbcast.lane.b32.xlu1 %v995_v6, 256 }
 0x2b6   : > { %976 = vbcast.lane.b32.xlu1 %v974_v59, 256 }
 0x2bf   : > { %v855_v11 = vpop.f32.mrf.mxu1 }
 0x2c0   : > { %v809_v12 = vpop.f32.mrf.mxu0  ;;  %v954_v13 = vadd.f32 %v855_v11, %v761_v10 }
 0x2c1   : > { %v1274_v14 = vpop.f32.mrf.mxu1 }
 0x2c2   : > { %958 = vst.msk [vmem:[#allocation4 + $0x8] sm:$0xff] %vm375_vm0, %v954_v13  ;;  %v1268_v15 = vpop.f32.mrf.mxu0 }
 0x2c3   : > { %v858_v18 = vpop.f32.mrf.mxu1 }
 0x2c4   : > { %v812_v20 = vpop.f32.mrf.mxu0 }
 0x2c5   : > { %v1275_v21 = vpop.f32.mrf.mxu1 }
 0x2c6   : > { %v1269_v16 = vpop.f32.mrf.mxu0 }
 0x2c7   : > { %v947_v26 = vpop.f32.mrf.mxu1 }
 0x2c8   : > { %v901_v27 = vpop.f32.mrf.mxu0  ;;  %v956_v28 = vadd.f32 %v947_v26, %v763_v22 }
 0x2c9   : > { %v955_v29 = vadd.f32 %v901_v27, %v762_v23  ;;  %v1286_v30 = vpop.f32.mrf.mxu1  ;;  %v968_v36 = vld [vmem:[#allocation4 + $0x8] sm:$0xff] }
 0x2ca   : > { %960 = vst.msk [vmem:[#allocation4 + $0x18] sm:$0xff] %vm375_vm0, %v956_v28  ;;  %v1280_v31 = vpop.f32.mrf.mxu0 }
 0x2cb   : > { %959 = vst.msk [vmem:[#allocation4 + $0x10] sm:$0xff] %vm375_vm0, %v955_v29  ;;  %v950_v24 = vpop.f32.mrf.mxu1 }
 0x2cc   : > { %v904_v25 = vpop.f32.mrf.mxu0 }
 0x2cd   : > { %v1287_v32 = vpop.f32.mrf.mxu1 }
 0x2ce   : > { %v1281_v33 = vpop.f32.mrf.mxu0 }
 0x2d1   : > { %v970_v42 = vld [vmem:[#allocation4 + $0x18] sm:$0xff] }
 0x2d2   : > { %v969_v35 = vld [vmem:[#allocation4 + $0x10] sm:$0xff] }
 0x320   : > { %v991_v34 = vpop.permute.xlu0 %990  ;;  %v984_v37 = vpop.permute.xlu1 %983 }
 0x321   : > { %v1001_v38 = vmul.f32 %v991_v34, %v969_v35  ;;  %v1000_v39 = vmul.f32 %v984_v37, %v968_v36 }
 0x323   : > { %1004 = vrot.lane.b32.xlu0 %v1000_v39, %s1361_s14  ;;  %1008 = vrot.lane.b32.xlu1 %v1001_v38, %s1362_s15 }
 0x324   : > { %v734_v41 = vpop.permute.xlu0 %733  ;;  %v998_v0 = vpop.permute.xlu1 %997 }
 0x325   : > { %v760_v43 = vmul.f32 %v756_v40, %v734_v41  ;;  %v1002_v44 = vmul.f32 %v998_v0, %v970_v42 }
 0x327   : > { %v953_v45 = vadd.f32 %v809_v12, %v760_v43  ;;  %1012 = vrot.lane.b32.xlu0 %v1002_v44, %s1363_s16 }
 0x328   : > { %v977_v47 = vpop.permute.xlu1 %976 }
 0x329   : > { %957 = vst.msk [vmem:[#allocation4] sm:$0xff] %vm375_vm0, %v953_v45 }
 0x330   : > { %v967_v46 = vld [vmem:[#allocation4] sm:$0xff] }
 0x331   : > { %v999_v48 = vmul.f32 %v977_v47, %v967_v46 }
 0x395   : > { %v1005_v50 = vpop.permute.xlu0 %1004  ;;  %v1009_v52 = vpop.permute.xlu1 %1008 }
 0x396   : > { %v1015_v51 = vsel %vm375_vm0, %v999_v48, %v1005_v50 }
 0x397   : > { %v1017_v53 = vsel %vm1016_vm11, %v1015_v51, %v1009_v52 }
 0x399   : > { %v1013_v54 = vpop.permute.xlu0 %1012 }
 0x39a   : > { %v1019_v55 = vsel %vm1018_vm12, %v1017_v53, %v1013_v54 }
 0x39b   : > { %v1020_v56 = vpack.c.bf16 %v1019_v55, %v1019_v55 }
 0x39d   : > { %1022 = vst.msk [vmem:[%s359_s23] sm:$0xf] %vm1021_vm13, %v1020_v56 }
 0x39e PF: > { %s16_s20 = sadd.s32 1, %s1355_s20   ;;  %s1601_s18 = smov %s1351_s19 }
 0x39f   : > { %p13_p5 = scmp.ge.s32.totalorder %s16_s20, 4   ;;  %s1602_s19 = smov %s1604_s21 }
 0x3a1   :  { %15 = sbr.rel (!%p13_p5) target bundleno = 2 (0x2), region = 95 }

// kernel: gpt_forward.17
= control target key start
LH: loop header
LB: loop body
LE: loop exit
PB: predicated region body
PF: predicated region fallthrough
CT: control target
= control target key end

     0   :  { %v149_v1 = vmov 0.0   ;;  %vm150_vm0 = vmmov 0   ;;  %s192_s0 = inlined_call_operand.vmem [shape: f32[16,32], index: 0, kind: input, shape index: {}]   ;;  %s193_s1 = inlined_call_operand.vmem [shape: bf16[32,32], index: 1, kind: input, shape index: {}]   ;;  %s194_s2 = inlined_call_operand.vmem [shape: f32[1,32], index: 2, kind: input, shape index: {}]   ;;  %s195_s3 = inlined_call_operand.hbm [shape: f32[16,32], index: 3, kind: output, shape index: {}]  }
   0x1   :  { %v125_v0 = vld [vmem:[%s193_s1 + $0x8] sm:$0xff]   ;;  %112 = vmatprep.subr.bf16.mxu0 %v149_v1  ;;  %v126_v2 = vld [vmem:[%s193_s1] sm:$0xff]   ;;  %116 = vmatprep.mubr.msk.bf16.mxu0 %vm150_vm0, %v149_v1 }
   0x2   :  { %113 = vmatpush3.bf16.msra.mxu0 %v125_v0  ;;  %v16_v3 = vld [vmem:[%s192_s0] sm:$0xff]  ;;  %v17_v4 = vld [vmem:[%s192_s0 + $0x8] sm:$0xff] }
   0x3   :  { %114 = vmatprep.subr.bf16.mxu0 %v149_v1 }
   0x4   :  { %8 = vsyncpa [#allocation3], 0  ;;  %v18_v5 = vpack.c.bf16 %v17_v4, %v16_v3  ;;  %vm42_vm1 = vcmask 261120   ;;  %v105_v6 = vld [vmem:[%s194_s2] ss:$0 sm:$0xff]  ;;  %s151_s1 = smov [#allocation2]  }
   0x5   :  { %s94_s22 = sshll.u32 %s151_s1, 4  ;;  %s95_s22 = int_to_ptr.vmem [resolvable:$true] %s94_s22 }
   0x6   :  { %115 = vmatpush3.bf16.msra.mxu0 %v126_v2  ;;  %s127_s0 = scalar_lea.vmem %s95_s22, 256  ;;  %p132_p1 = scmp.lt.s32.totalorder %s95_s22, %s95_s22 }
   0x7   :  { %p128_p0 = scmp.ne.s32.totalorder %s95_s22, %s127_s0  ;;  %p133_p2 = scmp.lt.s32.totalorder %s127_s0, %s127_s0 }
   0x9   :  { %117 = vmatmul.mubr.msk.bf16.vlgmr.msra.gmra.mxu0 %vm42_vm1, %v18_v5  ;;  %p134_p3 = por %p133_p2, %p132_p1 }
   0xb   :  { %p135_p4 = pnand %p134_p3, %p128_p0 }
  0xc9   :  { %v80_v7 = vpop.f32.mrf.mxu0 }
  0xca   :  { %v81_v8 = vadd.f32 %v105_v6, %v80_v7 }
  0xcb   :  { %v118_v9 = vpop.f32.mrf.mxu0 }
  0xcc   :  { %87 = vst.msk [vmem:[#allocation2] sm:$0xff] %vm42_vm1, %v81_v8 }
  0xcd   :  { %v83_v10 = vpop.f32.mrf.mxu0 }
  0xce   :  { %v84_v11 = vadd.f32 %v105_v6, %v83_v10 }
  0xcf   :  { %v119_v12 = vpop.f32.mrf.mxu0 }
  0xd0   :  { %88 = vst.msk [vmem:[#allocation2 + $0x8] sm:$0xff] %vm42_vm1, %v84_v11 }
  0xd1   :  { %138 = shalt.err (!%p135_p4)
}
  0xd2   :  { %s152_s23 = smov 128   ;;  %s153_s2 = smov 8  }
  0xd3   :  { %100 = dma.vmem_to_hbm [thread:$0]  %s95_s22, 256, %s195_s3, [#allocation3], %s152_s23, %s152_s23, %s153_s2  }
  0xd4   :  { %147 = dma.done.wait [#allocation3], 256  }
  0xd5   :  { %148 = vsyncadd [#allocation3], 4294967040 }
  0xd6   :  { %104 = vsyncpa [#allocation3], 1 }

</bundles_post_ra>
